<compile_context>
chip_gen: v5e
topology: v5e:2x2
jax: 0.10.0
libtpu: 0.0.40
codegen_flags: <defaults>
</compile_context>

<pallas_src>
import functools

import jax
import jax.numpy as jnp
from jax.experimental import pallas as pl
from jax.experimental.pallas import tpu as pltpu

_HIGHEST = jax.lax.Precision.HIGHEST
_VMEM_LIMIT_BYTES = 32 * 1024 * 1024      # safe scoped-VMEM request on v5e/v6e/v7x
_TILE_BUDGET_BYTES = 24 * 1024 * 1024     # per-step double-buffered working set
_SQRT_2_OVER_PI = 0.7978845608028654
_LN_EPS = 1e-5


def _gelu_tanh(x):
    # The spec's `GELU()` module is not defined in-file; assume the standard
    # tanh approximation 0.5*x*(1+tanh(sqrt(2/pi)*(x+0.044715*x^3))).
    return 0.5 * x * (1.0 + jnp.tanh(_SQRT_2_OVER_PI * (x + 0.044715 * x * x * x)))


def _pick_tile(dim, candidates):
    for c in candidates:
        if dim % c == 0:
            return c
    return dim  # small / non-divisible dims: use the full extent (exempt from (8,128))


def _pick_row_tile(rows, hidden, n_tensors, bytes_per_elem=4):
    # Largest row tile whose double-buffered (tile, hidden) operands fit the budget.
    denom = 2 * n_tensors * hidden * bytes_per_elem
    max_rows = max(8, _TILE_BUDGET_BYTES // denom)
    for cand in (1024, 512, 256, 128, 64, 32, 16, 8):
        if cand <= max_rows and rows % cand == 0:
            return cand
    return rows


# ---------------------------------------------------------------------------
# Kernel 1: tiled matmul + bias (+ optional fused GELU)
# ---------------------------------------------------------------------------
def _matmul_bias_kernel(x_ref, w_ref, b_ref, o_ref, acc_ref, *, activation):
    k = pl.program_id(2)

    @pl.when(k == 0)
    def _():
        acc_ref[...] = jnp.zeros_like(acc_ref)

    acc_ref[...] += jnp.dot(
        x_ref[...], w_ref[...],
        preferred_element_type=jnp.float32, precision=_HIGHEST)

    @pl.when(k == pl.num_programs(2) - 1)
    def _():
        out = acc_ref[...] + b_ref[...].astype(jnp.float32)
        if activation == "gelu":
            out = _gelu_tanh(out)
        o_ref[...] = out.astype(o_ref.dtype)


def linear(x2d, w, b=None, activation=None):
    """y = activation(x2d @ w + b); x2d: (M, K), w: (K, N), b: (N,) or None."""
    M, K = x2d.shape
    K2, N = w.shape
    assert K == K2
    if b is None:
        b = jnp.zeros((N,), dtype=x2d.dtype)
    b2d = b.reshape(1, N)

    tm = _pick_tile(M, (256, 128, 64, 32, 16, 8))
    tn = _pick_tile(N, (256, 128))
    tk = _pick_tile(K, (512, 256, 128))
    grid = (M // tm, N // tn, K // tk)

    kernel = functools.partial(_matmul_bias_kernel, activation=activation)
    return pl.pallas_call(
        kernel,
        out_shape=jax.ShapeDtypeStruct((M, N), x2d.dtype),
        grid=grid,
        in_specs=[
            pl.BlockSpec((tm, tk), lambda i, j, k: (i, k)),
            pl.BlockSpec((tk, tn), lambda i, j, k: (k, j)),
            pl.BlockSpec((1, tn), lambda i, j, k: (0, j)),
        ],
        out_specs=pl.BlockSpec((tm, tn), lambda i, j, k: (i, j)),
        scratch_shapes=[pltpu.VMEM((tm, tn), jnp.float32)],
        compiler_params=pltpu.CompilerParams(
            dimension_semantics=("parallel", "parallel", "arbitrary"),
            vmem_limit_bytes=_VMEM_LIMIT_BYTES,
        ),
    )(x2d, w, b2d)


# ---------------------------------------------------------------------------
# Kernel 2: per-(batch, head) attention (scores -> softmax -> context)
# ---------------------------------------------------------------------------
def _attention_kernel(q_ref, k_ref, v_ref, ctx_ref, att_ref, *, scale):
    q = q_ref[0].astype(jnp.float32)
    k = k_ref[0].astype(jnp.float32)
    v = v_ref[0].astype(jnp.float32)

    # scores = (Q @ K^T) / sqrt(head_dim)   (contraction on head_dim, no transpose op)
    scores = jax.lax.dot_general(
        q, k, (((1,), (1,)), ((), ())),
        preferred_element_type=jnp.float32, precision=_HIGHEST) * scale

    m = jnp.max(scores, axis=-1, keepdims=True)
    e = jnp.exp(scores - m)
    w = e / jnp.sum(e, axis=-1, keepdims=True)
    # TODO(synk): attention-weight dropout (p=0.1) treated as identity (eval mode).

    ctx = jnp.dot(w, v, preferred_element_type=jnp.float32, precision=_HIGHEST)

    att_ref[0] = w.astype(att_ref.dtype)
    ctx_ref[0] = ctx.astype(ctx_ref.dtype)


def multi_head_attention_core(q, k, v, num_heads):
    """q, k, v: (B, S, d_out).  Returns context (B, S, d_out), weights (B, H, S, S)."""
    B, S, D = q.shape
    hd = D // num_heads

    def split_heads(t):
        return t.reshape(B, S, num_heads, hd).transpose(0, 2, 1, 3).reshape(B * num_heads, S, hd)

    qh, kh, vh = split_heads(q), split_heads(k), split_heads(v)
    scale = 1.0 / (hd ** 0.5)

    kernel = functools.partial(_attention_kernel, scale=scale)
    ctx, att_w = pl.pallas_call(
        kernel,
        out_shape=(
            jax.ShapeDtypeStruct((B * num_heads, S, hd), q.dtype),
            jax.ShapeDtypeStruct((B * num_heads, S, S), jnp.float32),
        ),
        grid=(B * num_heads,),
        in_specs=[
            pl.BlockSpec((1, S, hd), lambda i: (i, 0, 0)),
            pl.BlockSpec((1, S, hd), lambda i: (i, 0, 0)),
            pl.BlockSpec((1, S, hd), lambda i: (i, 0, 0)),
        ],
        out_specs=(
            pl.BlockSpec((1, S, hd), lambda i: (i, 0, 0)),
            pl.BlockSpec((1, S, S), lambda i: (i, 0, 0)),
        ),
        compiler_params=pltpu.CompilerParams(
            dimension_semantics=("parallel",),
            vmem_limit_bytes=_VMEM_LIMIT_BYTES,
        ),
    )(qh, kh, vh)

    ctx = ctx.reshape(B, num_heads, S, hd).transpose(0, 2, 1, 3).reshape(B, S, D)
    att_w = att_w.reshape(B, num_heads, S, S)
    return ctx, att_w


# ---------------------------------------------------------------------------
# Kernel 3: fused residual-add + LayerNorm (PyTorch semantics: unbiased=False, eps=1e-5)
# ---------------------------------------------------------------------------
def _add_layernorm_kernel(x_ref, y_ref, gamma_ref, beta_ref, o_ref, *, eps):
    z = x_ref[...].astype(jnp.float32) + y_ref[...].astype(jnp.float32)
    mean = jnp.mean(z, axis=-1, keepdims=True)
    centered = z - mean
    var = jnp.mean(centered * centered, axis=-1, keepdims=True)   # unbiased=False
    inv_std = jax.lax.rsqrt(var + eps)                            # EUP rsqrt
    g_scaled = gamma_ref[...].astype(jnp.float32) * inv_std       # fused affine scale
    out = centered * g_scaled + beta_ref[...].astype(jnp.float32)
    o_ref[...] = out.astype(o_ref.dtype)


def add_layer_norm(x2d, y2d, gamma, beta, *, eps=_LN_EPS):
    rows, hidden = x2d.shape
    tile = _pick_row_tile(rows, hidden, n_tensors=3)  # x, y, out are (tile, hidden)
    grid = (rows // tile,)

    kernel = functools.partial(_add_layernorm_kernel, eps=eps)
    return pl.pallas_call(
        kernel,
        out_shape=jax.ShapeDtypeStruct((rows, hidden), x2d.dtype),
        grid=grid,
        in_specs=[
            pl.BlockSpec((tile, hidden), lambda i: (i, 0)),
            pl.BlockSpec((tile, hidden), lambda i: (i, 0)),
            # gamma/beta: constant block index -> fetched once, stays resident.
            pl.BlockSpec((1, hidden), lambda i: (0, 0)),
            pl.BlockSpec((1, hidden), lambda i: (0, 0)),
        ],
        out_specs=pl.BlockSpec((tile, hidden), lambda i: (i, 0)),
        compiler_params=pltpu.CompilerParams(
            dimension_semantics=("parallel",),
            vmem_limit_bytes=_VMEM_LIMIT_BYTES,
        ),
    )(x2d, y2d, gamma.reshape(1, hidden), beta.reshape(1, hidden))


# ---------------------------------------------------------------------------
# Full TransformerLayer forward
# ---------------------------------------------------------------------------
def transformer_layer(x, params, *, num_heads):
    B, S, d_in = x.shape
    d_out = params["w_q"].shape[1]
    x2d = x.reshape(B * S, d_in)

    # Multi-head attention (qkv_bias=False in the module defaults)
    q = linear(x2d, params["w_q"])
    k = linear(x2d, params["w_k"])
    v = linear(x2d, params["w_v"])
    ctx, att_w = multi_head_attention_core(
        q.reshape(B, S, d_out), k.reshape(B, S, d_out), v.reshape(B, S, d_out), num_heads)
    att_out = linear(ctx.reshape(B * S, d_out), params["w_o"], params["b_o"])

    # norm1(x + attention_output)
    h = add_layer_norm(x2d, att_out, params["gamma1"], params["beta1"])

    # FeedForward: Linear(d_in -> d_out) + GELU (fused) then Linear(d_out -> d_in)
    f1 = linear(h, params["w_f1"], params["b_f1"], activation="gelu")
    f2 = linear(f1, params["w_f2"], params["b_f2"])

    # norm2(h + ffn_output)
    out = add_layer_norm(h, f2, params["gamma2"], params["beta2"])
    return out.reshape(B, S, d_in), att_w


# ---------------------------------------------------------------------------
# Plain-JAX reference (mirrors the PyTorch module, eval mode)
# ---------------------------------------------------------------------------
def reference(x, p, num_heads):
    B, S, d_in = x.shape
    d_out = p["w_q"].shape[1]
    hd = d_out // num_heads

    def mm(a, b):
        return jnp.matmul(a, b, precision=_HIGHEST)

    q, k, v = mm(x, p["w_q"]), mm(x, p["w_k"]), mm(x, p["w_v"])

    def split(t):
        return t.reshape(B, S, num_heads, hd).transpose(0, 2, 1, 3)

    qh, kh, vh = split(q), split(k), split(v)
    scores = jnp.einsum("bhqd,bhkd->bhqk", qh, kh, precision=_HIGHEST) / (hd ** 0.5)
    w = jax.nn.softmax(scores, axis=-1)
    ctx = jnp.einsum("bhqk,bhkd->bhqd", w, vh, precision=_HIGHEST)
    ctx = ctx.transpose(0, 2, 1, 3).reshape(B, S, d_out)
    att_out = mm(ctx, p["w_o"]) + p["b_o"]

    def ln(z, g, b):
        m = jnp.mean(z, axis=-1, keepdims=True)
        va = jnp.mean((z - m) ** 2, axis=-1, keepdims=True)
        return g * (z - m) / jnp.sqrt(va + _LN_EPS) + b

    h = ln(x + att_out, p["gamma1"], p["beta1"])
    f = mm(_gelu_tanh(mm(h, p["w_f1"]) + p["b_f1"]), p["w_f2"]) + p["b_f2"]
    out = ln(h + f, p["gamma2"], p["beta2"])
    return out, w


if __name__ == "__main__":
    batch, seq, num_heads = 2, 8, 4
    d_in = d_out = 32          # the module's residual requires d_in == d_out
    head_dim = d_out // num_heads

    key = jax.random.PRNGKey(0)
    ks = jax.random.split(key, 12)

    def w_init(k, shape, fan_in):
        return (jax.random.normal(k, shape, dtype=jnp.float32) / jnp.sqrt(fan_in)).astype(jnp.float32)

    params = dict(
        w_q=w_init(ks[0], (d_in, d_out), d_in),
        w_k=w_init(ks[1], (d_in, d_out), d_in),
        w_v=w_init(ks[2], (d_in, d_out), d_in),
        w_o=w_init(ks[3], (d_out, d_out), d_out),
        b_o=0.02 * jax.random.normal(ks[4], (d_out,), dtype=jnp.float32),
        gamma1=jnp.ones((d_in,), jnp.float32),
        beta1=jnp.zeros((d_in,), jnp.float32),
        w_f1=w_init(ks[5], (d_in, d_out), d_in),
        b_f1=0.02 * jax.random.normal(ks[6], (d_out,), dtype=jnp.float32),
        w_f2=w_init(ks[7], (d_out, d_in), d_out),
        b_f2=0.02 * jax.random.normal(ks[8], (d_in,), dtype=jnp.float32),
        gamma2=jnp.ones((d_in,), jnp.float32),
        beta2=jnp.zeros((d_in,), jnp.float32),
    )

    x = jax.random.normal(ks[9], (batch, seq, d_in), dtype=jnp.float32)

    fwd = jax.jit(functools.partial(transformer_layer, num_heads=num_heads))
    out, att_w = fwd(x, params)
    out = jax.block_until_ready(out)
    att_w = jax.block_until_ready(att_w)

    ref_out, ref_w = reference(x, params, num_heads)

    assert out.shape == x.shape
    assert att_w.shape == (batch, num_heads, seq, seq)
    assert jnp.allclose(out, ref_out, atol=1e-3, rtol=1e-3), float(jnp.max(jnp.abs(out - ref_out)))
    assert jnp.allclose(att_w, ref_w, atol=1e-3, rtol=1e-3), float(jnp.max(jnp.abs(att_w - ref_w)))

    print("KERNEL_OK")
</pallas_src>

<mosaic_0001>
module attributes {stable_mosaic.version = 11 : i64} {
  func.func @_matmul_bias_kernel(%arg0: i32, %arg1: i32, %arg2: i32, %arg3: memref<16x32xf32, #tpu.memory_space<vmem>>, %arg4: memref<32x32xf32, #tpu.memory_space<vmem>>, %arg5: memref<1x32xf32, #tpu.memory_space<vmem>>, %arg6: memref<16x32xf32, #tpu.memory_space<vmem>>, %arg7: memref<16x32xf32, #tpu.memory_space<vmem>>) attributes {dimension_semantics = [#tpu.dimension_semantics<parallel>, #tpu.dimension_semantics<parallel>, #tpu.dimension_semantics<arbitrary>], iteration_bounds = array<i64: 1, 1, 1>, scalar_prefetch = 0 : i64, scratch_operands = 1 : i64, tpu.core_type = #tpu.core_type<tc>, window_params = [{transform_indices = @transform_0, window_bounds = array<i64: 16, 32>}, {transform_indices = @transform_1, window_bounds = array<i64: 32, 32>}, {transform_indices = @transform_2, window_bounds = array<i64: 1, 32>}, {transform_indices = @transform_3, window_bounds = array<i64: 16, 32>}]} {
    %c0_i32 = arith.constant 0 : i32
    %0 = arith.cmpi eq, %arg2, %c0_i32 : i32
    %1 = arith.extui %0 : i1 to i32
    %c0_i32_0 = arith.constant 0 : i32
    %2 = arith.cmpi ne, %1, %c0_i32_0 : i32
    scf.if %2 {
      %cst_10 = arith.constant 0.000000e+00 : f32
      %12 = vector.broadcast %cst_10 : f32 to vector<16x32xf32>
      %c0_11 = arith.constant 0 : index
      %c0_12 = arith.constant 0 : index
      %13 = vector.load %arg7[%c0_11, %c0_12] : memref<16x32xf32, #tpu.memory_space<vmem>>, vector<16x32xf32>
      tpu.vector_store %arg7[%c0_11, %c0_12], %12 {strides = array<i32>} : memref<16x32xf32, #tpu.memory_space<vmem>>, vector<16x32xf32>,
    } else {
    }
    %c0 = arith.constant 0 : index
    %c0_1 = arith.constant 0 : index
    %3 = vector.load %arg7[%c0, %c0_1] : memref<16x32xf32, #tpu.memory_space<vmem>>, vector<16x32xf32>
    %c0_2 = arith.constant 0 : index
    %c0_3 = arith.constant 0 : index
    %4 = vector.load %arg3[%c0_2, %c0_3] : memref<16x32xf32, #tpu.memory_space<vmem>>, vector<16x32xf32>
    %c0_4 = arith.constant 0 : index
    %c0_5 = arith.constant 0 : index
    %5 = vector.load %arg4[%c0_4, %c0_5] : memref<32x32xf32, #tpu.memory_space<vmem>>, vector<32x32xf32>
    %cst = arith.constant dense<0.000000e+00> : vector<16x32xf32>
    %6 = tpu.matmul %4, %5, %cst {dimension_numbers = #tpu.dot_dimension_numbers<[1], [0], [0], [1], [0, 0, 1, 1], [], []>, precision = #tpu.contract_precision<fp32>} : vector<16x32xf32>, vector<32x32xf32>, vector<16x32xf32> -> vector<16x32xf32>
    %7 = arith.addf %3, %6 : vector<16x32xf32>
    %c0_6 = arith.constant 0 : index
    %c0_7 = arith.constant 0 : index
    %8 = vector.load %arg7[%c0_6, %c0_7] : memref<16x32xf32, #tpu.memory_space<vmem>>, vector<16x32xf32>
    tpu.vector_store %arg7[%c0_6, %c0_7], %7 {strides = array<i32>} : memref<16x32xf32, #tpu.memory_space<vmem>>, vector<16x32xf32>,
    %c0_i32_8 = arith.constant 0 : i32
    %9 = arith.cmpi eq, %arg2, %c0_i32_8 : i32
    %10 = arith.extui %9 : i1 to i32
    %c0_i32_9 = arith.constant 0 : i32
    %11 = arith.cmpi ne, %10, %c0_i32_9 : i32
    scf.if %11 {
      %c0_10 = arith.constant 0 : index
      %c0_11 = arith.constant 0 : index
      %12 = vector.load %arg7[%c0_10, %c0_11] : memref<16x32xf32, #tpu.memory_space<vmem>>, vector<16x32xf32>
      %c0_12 = arith.constant 0 : index
      %c0_13 = arith.constant 0 : index
      %13 = vector.load %arg5[%c0_12, %c0_13] : memref<1x32xf32, #tpu.memory_space<vmem>>, vector<1x32xf32>
      %14 = vector.broadcast %13 : vector<1x32xf32> to vector<16x32xf32>
      %15 = arith.addf %12, %14 : vector<16x32xf32>
      %c0_14 = arith.constant 0 : index
      %c0_15 = arith.constant 0 : index
      %16 = vector.load %arg6[%c0_14, %c0_15] : memref<16x32xf32, #tpu.memory_space<vmem>>, vector<16x32xf32>
      tpu.vector_store %arg6[%c0_14, %c0_15], %15 {strides = array<i32>} : memref<16x32xf32, #tpu.memory_space<vmem>>, vector<16x32xf32>,
    } else {
    }
    return
  }
  func.func @transform_0(%arg0: i32, %arg1: i32, %arg2: i32) -> (i32, i32) {
    %c0_i32 = arith.constant 0 : i32
    return %arg0, %arg2 : i32, i32
  }
  func.func @transform_1(%arg0: i32, %arg1: i32, %arg2: i32) -> (i32, i32) {
    %c0_i32 = arith.constant 0 : i32
    return %arg2, %arg1 : i32, i32
  }
  func.func @transform_2(%arg0: i32, %arg1: i32, %arg2: i32) -> (i32, i32) {
    %c0_i32 = arith.constant 0 : i32
    %c0_i32_0 = arith.constant 0 : i32
    return %c0_i32, %arg1 : i32, i32
  }
  func.func @transform_3(%arg0: i32, %arg1: i32, %arg2: i32) -> (i32, i32) {
    %c0_i32 = arith.constant 0 : i32
    return %arg0, %arg1 : i32, i32
  }
}

module attributes {stable_mosaic.version = 11 : i64} {
  func.func @_attention_kernel(%arg0: i32, %arg1: memref<1x8x8xf32, #tpu.memory_space<vmem>>, %arg2: memref<1x8x8xf32, #tpu.memory_space<vmem>>, %arg3: memref<1x8x8xf32, #tpu.memory_space<vmem>>, %arg4: memref<1x8x8xf32, #tpu.memory_space<vmem>>, %arg5: memref<1x8x8xf32, #tpu.memory_space<vmem>>) attributes {dimension_semantics = [#tpu.dimension_semantics<parallel>], iteration_bounds = array<i64: 8>, scalar_prefetch = 0 : i64, scratch_operands = 0 : i64, tpu.core_type = #tpu.core_type<tc>, window_params = [{transform_indices = @transform_0, window_bounds = array<i64: 1, 8, 8>}, {transform_indices = @transform_1, window_bounds = array<i64: 1, 8, 8>}, {transform_indices = @transform_2, window_bounds = array<i64: 1, 8, 8>}, {transform_indices = @transform_3, window_bounds = array<i64: 1, 8, 8>}, {transform_indices = @transform_4, window_bounds = array<i64: 1, 8, 8>}]} {
    %c0 = arith.constant 0 : index
    %c0_0 = arith.constant 0 : index
    %c0_1 = arith.constant 0 : index
    %0 = vector.load %arg1[%c0, %c0_0, %c0_1] : memref<1x8x8xf32, #tpu.memory_space<vmem>>, vector<1x8x8xf32>
    %1 = vector.shape_cast %0 : vector<1x8x8xf32> to vector<8x8xf32>
    %c0_2 = arith.constant 0 : index
    %c0_3 = arith.constant 0 : index
    %c0_4 = arith.constant 0 : index
    %2 = vector.load %arg2[%c0_2, %c0_3, %c0_4] : memref<1x8x8xf32, #tpu.memory_space<vmem>>, vector<1x8x8xf32>
    %3 = vector.shape_cast %2 : vector<1x8x8xf32> to vector<8x8xf32>
    %c0_5 = arith.constant 0 : index
    %c0_6 = arith.constant 0 : index
    %c0_7 = arith.constant 0 : index
    %4 = vector.load %arg3[%c0_5, %c0_6, %c0_7] : memref<1x8x8xf32, #tpu.memory_space<vmem>>, vector<1x8x8xf32>
    %5 = vector.shape_cast %4 : vector<1x8x8xf32> to vector<8x8xf32>
    %cst = arith.constant dense<0.000000e+00> : vector<8x8xf32>
    %6 = tpu.matmul %1, %3, %cst {dimension_numbers = #tpu.dot_dimension_numbers<[1], [1], [0], [0], [0, 0, 1, 0], [], []>, precision = #tpu.contract_precision<fp32>} : vector<8x8xf32>, vector<8x8xf32>, vector<8x8xf32> -> vector<8x8xf32>
    %cst_8 = arith.constant 0.353553385 : f32
    %7 = vector.broadcast %cst_8 : f32 to vector<8x8xf32>
    %8 = arith.mulf %6, %7 : vector<8x8xf32>
    %cst_9 = arith.constant dense<0xFF800000> : vector<8xf32>
    %9 = vector.multi_reduction <maximumf>, %8, %cst_9 [1] : vector<8x8xf32> to vector<8xf32>
    %10 = vector.shape_cast %9 : vector<8xf32> to vector<8x1xf32>
    %11 = vector.broadcast %10 : vector<8x1xf32> to vector<8x8xf32>
    %12 = arith.subf %8, %11 : vector<8x8xf32>
    %13 = math.exp %12 : vector<8x8xf32>
    %cst_10 = arith.constant dense<0.000000e+00> : vector<8xf32>
    %14 = vector.multi_reduction <add>, %13, %cst_10 [1] : vector<8x8xf32> to vector<8xf32>
    %15 = vector.shape_cast %14 : vector<8xf32> to vector<8x1xf32>
    %16 = vector.broadcast %15 : vector<8x1xf32> to vector<8x8xf32>
    %17 = arith.divf %13, %16 : vector<8x8xf32>
    %cst_11 = arith.constant dense<0.000000e+00> : vector<8x8xf32>
    %18 = tpu.matmul %17, %5, %cst_11 {dimension_numbers = #tpu.dot_dimension_numbers<[1], [0], [0], [1], [0, 0, 1, 1], [], []>, precision = #tpu.contract_precision<fp32>} : vector<8x8xf32>, vector<8x8xf32>, vector<8x8xf32> -> vector<8x8xf32>
    %c0_12 = arith.constant 0 : index
    %c0_13 = arith.constant 0 : index
    %c0_14 = arith.constant 0 : index
    %19 = vector.load %arg5[%c0_12, %c0_13, %c0_14] : memref<1x8x8xf32, #tpu.memory_space<vmem>>, vector<1x8x8xf32>
    %20 = vector.shape_cast %19 : vector<1x8x8xf32> to vector<8x8xf32>
    %21 = vector.shape_cast %17 : vector<8x8xf32> to vector<1x8x8xf32>
    tpu.vector_store %arg5[%c0_12, %c0_13, %c0_14], %21 {strides = array<i32>} : memref<1x8x8xf32, #tpu.memory_space<vmem>>, vector<1x8x8xf32>,
    %c0_15 = arith.constant 0 : index
    %c0_16 = arith.constant 0 : index
    %c0_17 = arith.constant 0 : index
    %22 = vector.load %arg4[%c0_15, %c0_16, %c0_17] : memref<1x8x8xf32, #tpu.memory_space<vmem>>, vector<1x8x8xf32>
    %23 = vector.shape_cast %22 : vector<1x8x8xf32> to vector<8x8xf32>
    %24 = vector.shape_cast %18 : vector<8x8xf32> to vector<1x8x8xf32>
    tpu.vector_store %arg4[%c0_15, %c0_16, %c0_17], %24 {strides = array<i32>} : memref<1x8x8xf32, #tpu.memory_space<vmem>>, vector<1x8x8xf32>,
    return
  }
  func.func @transform_0(%arg0: i32) -> (i32, i32, i32) {
    %c0_i32 = arith.constant 0 : i32
    %c0_i32_0 = arith.constant 0 : i32
    %c0_i32_1 = arith.constant 0 : i32
    return %arg0, %c0_i32, %c0_i32_0 : i32, i32, i32
  }
  func.func @transform_1(%arg0: i32) -> (i32, i32, i32) {
    %c0_i32 = arith.constant 0 : i32
    %c0_i32_0 = arith.constant 0 : i32
    %c0_i32_1 = arith.constant 0 : i32
    return %arg0, %c0_i32, %c0_i32_0 : i32, i32, i32
  }
  func.func @transform_2(%arg0: i32) -> (i32, i32, i32) {
    %c0_i32 = arith.constant 0 : i32
    %c0_i32_0 = arith.constant 0 : i32
    %c0_i32_1 = arith.constant 0 : i32
    return %arg0, %c0_i32, %c0_i32_0 : i32, i32, i32
  }
  func.func @transform_3(%arg0: i32) -> (i32, i32, i32) {
    %c0_i32 = arith.constant 0 : i32
    %c0_i32_0 = arith.constant 0 : i32
    %c0_i32_1 = arith.constant 0 : i32
    return %arg0, %c0_i32, %c0_i32_0 : i32, i32, i32
  }
  func.func @transform_4(%arg0: i32) -> (i32, i32, i32) {
    %c0_i32 = arith.constant 0 : i32
    %c0_i32_0 = arith.constant 0 : i32
    %c0_i32_1 = arith.constant 0 : i32
    return %arg0, %c0_i32, %c0_i32_0 : i32, i32, i32
  }
}

module attributes {stable_mosaic.version = 11 : i64} {
  func.func @_matmul_bias_kernel(%arg0: i32, %arg1: i32, %arg2: i32, %arg3: memref<16x32xf32, #tpu.memory_space<vmem>>, %arg4: memref<32x32xf32, #tpu.memory_space<vmem>>, %arg5: memref<1x32xf32, #tpu.memory_space<vmem>>, %arg6: memref<16x32xf32, #tpu.memory_space<vmem>>, %arg7: memref<16x32xf32, #tpu.memory_space<vmem>>) attributes {dimension_semantics = [#tpu.dimension_semantics<parallel>, #tpu.dimension_semantics<parallel>, #tpu.dimension_semantics<arbitrary>], iteration_bounds = array<i64: 1, 1, 1>, scalar_prefetch = 0 : i64, scratch_operands = 1 : i64, tpu.core_type = #tpu.core_type<tc>, window_params = [{transform_indices = @transform_0, window_bounds = array<i64: 16, 32>}, {transform_indices = @transform_1, window_bounds = array<i64: 32, 32>}, {transform_indices = @transform_2, window_bounds = array<i64: 1, 32>}, {transform_indices = @transform_3, window_bounds = array<i64: 16, 32>}]} {
    %c0_i32 = arith.constant 0 : i32
    %0 = arith.cmpi eq, %arg2, %c0_i32 : i32
    %1 = arith.extui %0 : i1 to i32
    %c0_i32_0 = arith.constant 0 : i32
    %2 = arith.cmpi ne, %1, %c0_i32_0 : i32
    scf.if %2 {
      %cst_10 = arith.constant 0.000000e+00 : f32
      %12 = vector.broadcast %cst_10 : f32 to vector<16x32xf32>
      %c0_11 = arith.constant 0 : index
      %c0_12 = arith.constant 0 : index
      %13 = vector.load %arg7[%c0_11, %c0_12] : memref<16x32xf32, #tpu.memory_space<vmem>>, vector<16x32xf32>
      tpu.vector_store %arg7[%c0_11, %c0_12], %12 {strides = array<i32>} : memref<16x32xf32, #tpu.memory_space<vmem>>, vector<16x32xf32>,
    } else {
    }
    %c0 = arith.constant 0 : index
    %c0_1 = arith.constant 0 : index
    %3 = vector.load %arg7[%c0, %c0_1] : memref<16x32xf32, #tpu.memory_space<vmem>>, vector<16x32xf32>
    %c0_2 = arith.constant 0 : index
    %c0_3 = arith.constant 0 : index
    %4 = vector.load %arg3[%c0_2, %c0_3] : memref<16x32xf32, #tpu.memory_space<vmem>>, vector<16x32xf32>
    %c0_4 = arith.constant 0 : index
    %c0_5 = arith.constant 0 : index
    %5 = vector.load %arg4[%c0_4, %c0_5] : memref<32x32xf32, #tpu.memory_space<vmem>>, vector<32x32xf32>
    %cst = arith.constant dense<0.000000e+00> : vector<16x32xf32>
    %6 = tpu.matmul %4, %5, %cst {dimension_numbers = #tpu.dot_dimension_numbers<[1], [0], [0], [1], [0, 0, 1, 1], [], []>, precision = #tpu.contract_precision<fp32>} : vector<16x32xf32>, vector<32x32xf32>, vector<16x32xf32> -> vector<16x32xf32>
    %7 = arith.addf %3, %6 : vector<16x32xf32>
    %c0_6 = arith.constant 0 : index
    %c0_7 = arith.constant 0 : index
    %8 = vector.load %arg7[%c0_6, %c0_7] : memref<16x32xf32, #tpu.memory_space<vmem>>, vector<16x32xf32>
    tpu.vector_store %arg7[%c0_6, %c0_7], %7 {strides = array<i32>} : memref<16x32xf32, #tpu.memory_space<vmem>>, vector<16x32xf32>,
    %c0_i32_8 = arith.constant 0 : i32
    %9 = arith.cmpi eq, %arg2, %c0_i32_8 : i32
    %10 = arith.extui %9 : i1 to i32
    %c0_i32_9 = arith.constant 0 : i32
    %11 = arith.cmpi ne, %10, %c0_i32_9 : i32
    scf.if %11 {
      %c0_10 = arith.constant 0 : index
      %c0_11 = arith.constant 0 : index
      %12 = vector.load %arg7[%c0_10, %c0_11] : memref<16x32xf32, #tpu.memory_space<vmem>>, vector<16x32xf32>
      %c0_12 = arith.constant 0 : index
      %c0_13 = arith.constant 0 : index
      %13 = vector.load %arg5[%c0_12, %c0_13] : memref<1x32xf32, #tpu.memory_space<vmem>>, vector<1x32xf32>
      %14 = vector.broadcast %13 : vector<1x32xf32> to vector<16x32xf32>
      %15 = arith.addf %12, %14 : vector<16x32xf32>
      %c0_14 = arith.constant 0 : index
      %c0_15 = arith.constant 0 : index
      %16 = vector.load %arg6[%c0_14, %c0_15] : memref<16x32xf32, #tpu.memory_space<vmem>>, vector<16x32xf32>
      tpu.vector_store %arg6[%c0_14, %c0_15], %15 {strides = array<i32>} : memref<16x32xf32, #tpu.memory_space<vmem>>, vector<16x32xf32>,
    } else {
    }
    return
  }
  func.func @transform_0(%arg0: i32, %arg1: i32, %arg2: i32) -> (i32, i32) {
    %c0_i32 = arith.constant 0 : i32
    return %arg0, %arg2 : i32, i32
  }
  func.func @transform_1(%arg0: i32, %arg1: i32, %arg2: i32) -> (i32, i32) {
    %c0_i32 = arith.constant 0 : i32
    return %arg2, %arg1 : i32, i32
  }
  func.func @transform_2(%arg0: i32, %arg1: i32, %arg2: i32) -> (i32, i32) {
    %c0_i32 = arith.constant 0 : i32
    %c0_i32_0 = arith.constant 0 : i32
    return %c0_i32, %arg1 : i32, i32
  }
  func.func @transform_3(%arg0: i32, %arg1: i32, %arg2: i32) -> (i32, i32) {
    %c0_i32 = arith.constant 0 : i32
    return %arg0, %arg1 : i32, i32
  }
}

module attributes {stable_mosaic.version = 11 : i64} {
  func.func @_add_layernorm_kernel(%arg0: i32, %arg1: memref<16x32xf32, #tpu.memory_space<vmem>>, %arg2: memref<16x32xf32, #tpu.memory_space<vmem>>, %arg3: memref<1x32xf32, #tpu.memory_space<vmem>>, %arg4: memref<1x32xf32, #tpu.memory_space<vmem>>, %arg5: memref<16x32xf32, #tpu.memory_space<vmem>>) attributes {dimension_semantics = [#tpu.dimension_semantics<parallel>], iteration_bounds = array<i64: 1>, scalar_prefetch = 0 : i64, scratch_operands = 0 : i64, tpu.core_type = #tpu.core_type<tc>, window_params = [{transform_indices = @transform_0, window_bounds = array<i64: 16, 32>}, {transform_indices = @transform_1, window_bounds = array<i64: 16, 32>}, {pipeline_mode = #tpu.pipeline_mode<synchronous>, transform_indices = @transform_2, window_bounds = array<i64: 1, 32>}, {pipeline_mode = #tpu.pipeline_mode<synchronous>, transform_indices = @transform_3, window_bounds = array<i64: 1, 32>}, {transform_indices = @transform_4, window_bounds = array<i64: 16, 32>}]} {
    %c0 = arith.constant 0 : index
    %c0_0 = arith.constant 0 : index
    %0 = vector.load %arg1[%c0, %c0_0] : memref<16x32xf32, #tpu.memory_space<vmem>>, vector<16x32xf32>
    %c0_1 = arith.constant 0 : index
    %c0_2 = arith.constant 0 : index
    %1 = vector.load %arg2[%c0_1, %c0_2] : memref<16x32xf32, #tpu.memory_space<vmem>>, vector<16x32xf32>
    %2 = arith.addf %0, %1 : vector<16x32xf32>
    %cst = arith.constant dense<0.000000e+00> : vector<16xf32>
    %3 = vector.multi_reduction <add>, %2, %cst [1] : vector<16x32xf32> to vector<16xf32>
    %4 = vector.shape_cast %3 : vector<16xf32> to vector<16x1xf32>
    %cst_3 = arith.constant 3.200000e+01 : f32
    %5 = vector.broadcast %cst_3 : f32 to vector<16x1xf32>
    %6 = arith.divf %4, %5 : vector<16x1xf32>
    %7 = vector.broadcast %6 : vector<16x1xf32> to vector<16x32xf32>
    %8 = arith.subf %2, %7 : vector<16x32xf32>
    %9 = arith.mulf %8, %8 : vector<16x32xf32>
    %cst_4 = arith.constant dense<0.000000e+00> : vector<16xf32>
    %10 = vector.multi_reduction <add>, %9, %cst_4 [1] : vector<16x32xf32> to vector<16xf32>
    %11 = vector.shape_cast %10 : vector<16xf32> to vector<16x1xf32>
    %cst_5 = arith.constant 3.200000e+01 : f32
    %12 = vector.broadcast %cst_5 : f32 to vector<16x1xf32>
    %13 = arith.divf %11, %12 : vector<16x1xf32>
    %cst_6 = arith.constant 9.99999974E-6 : f32
    %14 = vector.broadcast %cst_6 : f32 to vector<16x1xf32>
    %15 = arith.addf %13, %14 : vector<16x1xf32>
    %16 = math.rsqrt %15 : vector<16x1xf32>
    %c0_7 = arith.constant 0 : index
    %c0_8 = arith.constant 0 : index
    %17 = vector.load %arg3[%c0_7, %c0_8] : memref<1x32xf32, #tpu.memory_space<vmem>>, vector<1x32xf32>
    %18 = vector.broadcast %17 : vector<1x32xf32> to vector<16x32xf32>
    %19 = vector.broadcast %16 : vector<16x1xf32> to vector<16x32xf32>
    %20 = arith.mulf %18, %19 : vector<16x32xf32>
    %21 = arith.mulf %8, %20 : vector<16x32xf32>
    %c0_9 = arith.constant 0 : index
    %c0_10 = arith.constant 0 : index
    %22 = vector.load %arg4[%c0_9, %c0_10] : memref<1x32xf32, #tpu.memory_space<vmem>>, vector<1x32xf32>
    %23 = vector.broadcast %22 : vector<1x32xf32> to vector<16x32xf32>
    %24 = arith.addf %21, %23 : vector<16x32xf32>
    %c0_11 = arith.constant 0 : index
    %c0_12 = arith.constant 0 : index
    %25 = vector.load %arg5[%c0_11, %c0_12] : memref<16x32xf32, #tpu.memory_space<vmem>>, vector<16x32xf32>
    tpu.vector_store %arg5[%c0_11, %c0_12], %24 {strides = array<i32>} : memref<16x32xf32, #tpu.memory_space<vmem>>, vector<16x32xf32>,
    return
  }
  func.func @transform_0(%arg0: i32) -> (i32, i32) {
    %c0_i32 = arith.constant 0 : i32
    %c0_i32_0 = arith.constant 0 : i32
    return %arg0, %c0_i32 : i32, i32
  }
  func.func @transform_1(%arg0: i32) -> (i32, i32) {
    %c0_i32 = arith.constant 0 : i32
    %c0_i32_0 = arith.constant 0 : i32
    return %arg0, %c0_i32 : i32, i32
  }
  func.func @transform_2(%arg0: i32) -> (i32, i32) {
    %c0_i32 = arith.constant 0 : i32
    %c0_i32_0 = arith.constant 0 : i32
    %c0_i32_1 = arith.constant 0 : i32
    return %c0_i32, %c0_i32_0 : i32, i32
  }
  func.func @transform_3(%arg0: i32) -> (i32, i32) {
    %c0_i32 = arith.constant 0 : i32
    %c0_i32_0 = arith.constant 0 : i32
    %c0_i32_1 = arith.constant 0 : i32
    return %c0_i32, %c0_i32_0 : i32, i32
  }
  func.func @transform_4(%arg0: i32) -> (i32, i32) {
    %c0_i32 = arith.constant 0 : i32
    %c0_i32_0 = arith.constant 0 : i32
    return %arg0, %c0_i32 : i32, i32
  }
}

module attributes {stable_mosaic.version = 11 : i64} {
  func.func @_matmul_bias_kernel(%arg0: i32, %arg1: i32, %arg2: i32, %arg3: memref<16x32xf32, #tpu.memory_space<vmem>>, %arg4: memref<32x32xf32, #tpu.memory_space<vmem>>, %arg5: memref<1x32xf32, #tpu.memory_space<vmem>>, %arg6: memref<16x32xf32, #tpu.memory_space<vmem>>, %arg7: memref<16x32xf32, #tpu.memory_space<vmem>>) attributes {dimension_semantics = [#tpu.dimension_semantics<parallel>, #tpu.dimension_semantics<parallel>, #tpu.dimension_semantics<arbitrary>], iteration_bounds = array<i64: 1, 1, 1>, scalar_prefetch = 0 : i64, scratch_operands = 1 : i64, tpu.core_type = #tpu.core_type<tc>, window_params = [{transform_indices = @transform_0, window_bounds = array<i64: 16, 32>}, {transform_indices = @transform_1, window_bounds = array<i64: 32, 32>}, {transform_indices = @transform_2, window_bounds = array<i64: 1, 32>}, {transform_indices = @transform_3, window_bounds = array<i64: 16, 32>}]} {
    %c0_i32 = arith.constant 0 : i32
    %0 = arith.cmpi eq, %arg2, %c0_i32 : i32
    %1 = arith.extui %0 : i1 to i32
    %c0_i32_0 = arith.constant 0 : i32
    %2 = arith.cmpi ne, %1, %c0_i32_0 : i32
    scf.if %2 {
      %cst_10 = arith.constant 0.000000e+00 : f32
      %12 = vector.broadcast %cst_10 : f32 to vector<16x32xf32>
      %c0_11 = arith.constant 0 : index
      %c0_12 = arith.constant 0 : index
      %13 = vector.load %arg7[%c0_11, %c0_12] : memref<16x32xf32, #tpu.memory_space<vmem>>, vector<16x32xf32>
      tpu.vector_store %arg7[%c0_11, %c0_12], %12 {strides = array<i32>} : memref<16x32xf32, #tpu.memory_space<vmem>>, vector<16x32xf32>,
    } else {
    }
    %c0 = arith.constant 0 : index
    %c0_1 = arith.constant 0 : index
    %3 = vector.load %arg7[%c0, %c0_1] : memref<16x32xf32, #tpu.memory_space<vmem>>, vector<16x32xf32>
    %c0_2 = arith.constant 0 : index
    %c0_3 = arith.constant 0 : index
    %4 = vector.load %arg3[%c0_2, %c0_3] : memref<16x32xf32, #tpu.memory_space<vmem>>, vector<16x32xf32>
    %c0_4 = arith.constant 0 : index
    %c0_5 = arith.constant 0 : index
    %5 = vector.load %arg4[%c0_4, %c0_5] : memref<32x32xf32, #tpu.memory_space<vmem>>, vector<32x32xf32>
    %cst = arith.constant dense<0.000000e+00> : vector<16x32xf32>
    %6 = tpu.matmul %4, %5, %cst {dimension_numbers = #tpu.dot_dimension_numbers<[1], [0], [0], [1], [0, 0, 1, 1], [], []>, precision = #tpu.contract_precision<fp32>} : vector<16x32xf32>, vector<32x32xf32>, vector<16x32xf32> -> vector<16x32xf32>
    %7 = arith.addf %3, %6 : vector<16x32xf32>
    %c0_6 = arith.constant 0 : index
    %c0_7 = arith.constant 0 : index
    %8 = vector.load %arg7[%c0_6, %c0_7] : memref<16x32xf32, #tpu.memory_space<vmem>>, vector<16x32xf32>
    tpu.vector_store %arg7[%c0_6, %c0_7], %7 {strides = array<i32>} : memref<16x32xf32, #tpu.memory_space<vmem>>, vector<16x32xf32>,
    %c0_i32_8 = arith.constant 0 : i32
    %9 = arith.cmpi eq, %arg2, %c0_i32_8 : i32
    %10 = arith.extui %9 : i1 to i32
    %c0_i32_9 = arith.constant 0 : i32
    %11 = arith.cmpi ne, %10, %c0_i32_9 : i32
    scf.if %11 {
      %c0_10 = arith.constant 0 : index
      %c0_11 = arith.constant 0 : index
      %12 = vector.load %arg7[%c0_10, %c0_11] : memref<16x32xf32, #tpu.memory_space<vmem>>, vector<16x32xf32>
      %c0_12 = arith.constant 0 : index
      %c0_13 = arith.constant 0 : index
      %13 = vector.load %arg5[%c0_12, %c0_13] : memref<1x32xf32, #tpu.memory_space<vmem>>, vector<1x32xf32>
      %14 = vector.broadcast %13 : vector<1x32xf32> to vector<16x32xf32>
      %15 = arith.addf %12, %14 : vector<16x32xf32>
      %cst_14 = arith.constant 5.000000e-01 : f32
      %16 = vector.broadcast %cst_14 : f32 to vector<16x32xf32>
      %17 = arith.mulf %16, %15 : vector<16x32xf32>
      %cst_15 = arith.constant 4.471500e-02 : f32
      %18 = vector.broadcast %cst_15 : f32 to vector<16x32xf32>
      %19 = arith.mulf %18, %15 : vector<16x32xf32>
      %20 = arith.mulf %19, %15 : vector<16x32xf32>
      %21 = arith.mulf %20, %15 : vector<16x32xf32>
      %22 = arith.addf %15, %21 : vector<16x32xf32>
      %cst_16 = arith.constant 0.797884583 : f32
      %23 = vector.broadcast %cst_16 : f32 to vector<16x32xf32>
      %24 = arith.mulf %23, %22 : vector<16x32xf32>
      %25 = math.tanh %24 : vector<16x32xf32>
      %cst_17 = arith.constant 1.000000e+00 : f32
      %26 = vector.broadcast %cst_17 : f32 to vector<16x32xf32>
      %27 = arith.addf %26, %25 : vector<16x32xf32>
      %28 = arith.mulf %17, %27 : vector<16x32xf32>
      %c0_18 = arith.constant 0 : index
      %c0_19 = arith.constant 0 : index
      %29 = vector.load %arg6[%c0_18, %c0_19] : memref<16x32xf32, #tpu.memory_space<vmem>>, vector<16x32xf32>
      tpu.vector_store %arg6[%c0_18, %c0_19], %28 {strides = array<i32>} : memref<16x32xf32, #tpu.memory_space<vmem>>, vector<16x32xf32>,
    } else {
    }
    return
  }
  func.func @transform_0(%arg0: i32, %arg1: i32, %arg2: i32) -> (i32, i32) {
    %c0_i32 = arith.constant 0 : i32
    return %arg0, %arg2 : i32, i32
  }
  func.func @transform_1(%arg0: i32, %arg1: i32, %arg2: i32) -> (i32, i32) {
    %c0_i32 = arith.constant 0 : i32
    return %arg2, %arg1 : i32, i32
  }
  func.func @transform_2(%arg0: i32, %arg1: i32, %arg2: i32) -> (i32, i32) {
    %c0_i32 = arith.constant 0 : i32
    %c0_i32_0 = arith.constant 0 : i32
    return %c0_i32, %arg1 : i32, i32
  }
  func.func @transform_3(%arg0: i32, %arg1: i32, %arg2: i32) -> (i32, i32) {
    %c0_i32 = arith.constant 0 : i32
    return %arg0, %arg1 : i32, i32
  }
}

module attributes {stable_mosaic.version = 11 : i64} {
  func.func @_add_layernorm_kernel(%arg0: i32, %arg1: memref<16x32xf32, #tpu.memory_space<vmem>>, %arg2: memref<16x32xf32, #tpu.memory_space<vmem>>, %arg3: memref<1x32xf32, #tpu.memory_space<vmem>>, %arg4: memref<1x32xf32, #tpu.memory_space<vmem>>, %arg5: memref<16x32xf32, #tpu.memory_space<vmem>>) attributes {dimension_semantics = [#tpu.dimension_semantics<parallel>], iteration_bounds = array<i64: 1>, scalar_prefetch = 0 : i64, scratch_operands = 0 : i64, tpu.core_type = #tpu.core_type<tc>, window_params = [{transform_indices = @transform_0, window_bounds = array<i64: 16, 32>}, {transform_indices = @transform_1, window_bounds = array<i64: 16, 32>}, {pipeline_mode = #tpu.pipeline_mode<synchronous>, transform_indices = @transform_2, window_bounds = array<i64: 1, 32>}, {pipeline_mode = #tpu.pipeline_mode<synchronous>, transform_indices = @transform_3, window_bounds = array<i64: 1, 32>}, {transform_indices = @transform_4, window_bounds = array<i64: 16, 32>}]} {
    %c0 = arith.constant 0 : index
    %c0_0 = arith.constant 0 : index
    %0 = vector.load %arg1[%c0, %c0_0] : memref<16x32xf32, #tpu.memory_space<vmem>>, vector<16x32xf32>
    %c0_1 = arith.constant 0 : index
    %c0_2 = arith.constant 0 : index
    %1 = vector.load %arg2[%c0_1, %c0_2] : memref<16x32xf32, #tpu.memory_space<vmem>>, vector<16x32xf32>
    %2 = arith.addf %0, %1 : vector<16x32xf32>
    %cst = arith.constant dense<0.000000e+00> : vector<16xf32>
    %3 = vector.multi_reduction <add>, %2, %cst [1] : vector<16x32xf32> to vector<16xf32>
    %4 = vector.shape_cast %3 : vector<16xf32> to vector<16x1xf32>
    %cst_3 = arith.constant 3.200000e+01 : f32
    %5 = vector.broadcast %cst_3 : f32 to vector<16x1xf32>
    %6 = arith.divf %4, %5 : vector<16x1xf32>
    %7 = vector.broadcast %6 : vector<16x1xf32> to vector<16x32xf32>
    %8 = arith.subf %2, %7 : vector<16x32xf32>
    %9 = arith.mulf %8, %8 : vector<16x32xf32>
    %cst_4 = arith.constant dense<0.000000e+00> : vector<16xf32>
    %10 = vector.multi_reduction <add>, %9, %cst_4 [1] : vector<16x32xf32> to vector<16xf32>
    %11 = vector.shape_cast %10 : vector<16xf32> to vector<16x1xf32>
    %cst_5 = arith.constant 3.200000e+01 : f32
    %12 = vector.broadcast %cst_5 : f32 to vector<16x1xf32>
    %13 = arith.divf %11, %12 : vector<16x1xf32>
    %cst_6 = arith.constant 9.99999974E-6 : f32
    %14 = vector.broadcast %cst_6 : f32 to vector<16x1xf32>
    %15 = arith.addf %13, %14 : vector<16x1xf32>
    %16 = math.rsqrt %15 : vector<16x1xf32>
    %c0_7 = arith.constant 0 : index
    %c0_8 = arith.constant 0 : index
    %17 = vector.load %arg3[%c0_7, %c0_8] : memref<1x32xf32, #tpu.memory_space<vmem>>, vector<1x32xf32>
    %18 = vector.broadcast %17 : vector<1x32xf32> to vector<16x32xf32>
    %19 = vector.broadcast %16 : vector<16x1xf32> to vector<16x32xf32>
    %20 = arith.mulf %18, %19 : vector<16x32xf32>
    %21 = arith.mulf %8, %20 : vector<16x32xf32>
    %c0_9 = arith.constant 0 : index
    %c0_10 = arith.constant 0 : index
    %22 = vector.load %arg4[%c0_9, %c0_10] : memref<1x32xf32, #tpu.memory_space<vmem>>, vector<1x32xf32>
    %23 = vector.broadcast %22 : vector<1x32xf32> to vector<16x32xf32>
    %24 = arith.addf %21, %23 : vector<16x32xf32>
    %c0_11 = arith.constant 0 : index
    %c0_12 = arith.constant 0 : index
    %25 = vector.load %arg5[%c0_11, %c0_12] : memref<16x32xf32, #tpu.memory_space<vmem>>, vector<16x32xf32>
    tpu.vector_store %arg5[%c0_11, %c0_12], %24 {strides = array<i32>} : memref<16x32xf32, #tpu.memory_space<vmem>>, vector<16x32xf32>,
    return
  }
  func.func @transform_0(%arg0: i32) -> (i32, i32) {
    %c0_i32 = arith.constant 0 : i32
    %c0_i32_0 = arith.constant 0 : i32
    return %arg0, %c0_i32 : i32, i32
  }
  func.func @transform_1(%arg0: i32) -> (i32, i32) {
    %c0_i32 = arith.constant 0 : i32
    %c0_i32_0 = arith.constant 0 : i32
    return %arg0, %c0_i32 : i32, i32
  }
  func.func @transform_2(%arg0: i32) -> (i32, i32) {
    %c0_i32 = arith.constant 0 : i32
    %c0_i32_0 = arith.constant 0 : i32
    %c0_i32_1 = arith.constant 0 : i32
    return %c0_i32, %c0_i32_0 : i32, i32
  }
  func.func @transform_3(%arg0: i32) -> (i32, i32) {
    %c0_i32 = arith.constant 0 : i32
    %c0_i32_0 = arith.constant 0 : i32
    %c0_i32_1 = arith.constant 0 : i32
    return %c0_i32, %c0_i32_0 : i32, i32
  }
  func.func @transform_4(%arg0: i32) -> (i32, i32) {
    %c0_i32 = arith.constant 0 : i32
    %c0_i32_0 = arith.constant 0 : i32
    return %arg0, %c0_i32 : i32, i32
  }
}

</mosaic_0001>

<bundles_post_ra>
// kernel: transformer_layer.11
= control target key start
LH: loop header
LB: loop body
LE: loop exit
PB: predicated region body
PF: predicated region fallthrough
CT: control target
= control target key end

     0   :  { %8 = vsyncpa [#allocation4], 0  ;;  %s448_s0 = inlined_call_operand.hbm [shape: f32[16,32], index: 0, kind: input, shape index: {}]   ;;  %s449_s1 = inlined_call_operand.hbm [shape: f32[32,32], index: 1, kind: input, shape index: {}]   ;;  %s450_s2 = inlined_call_operand.vmem [shape: f32[1,32], index: 2, kind: input, shape index: {}]   ;;  %s451_s3 = inlined_call_operand.vmem [shape: f32[16,32], index: 3, kind: output, shape index: {}]  }
   0x1   :  { %s14_s14 = sshll.u32 %s448_s0, 4  ;;  %s15_s14 = int_to_ptr.hbm [resolvable:$true] %s14_s14 }
   0x2   :  { %9 = vsyncpa [#allocation6], 0  ;;  %s373_s15 = smov [#allocation3]   ;;  %s27_s19 = sshll.u32 %s449_s1, 4  ;;  %s28_s19 = int_to_ptr.hbm [resolvable:$true] %s27_s19 }
   0x3   :  { %s16_s16 = sshll.u32 %s373_s15, 4  ;;  %s374_s20 = smov 128   ;;  %s17_s16 = int_to_ptr.vmem [resolvable:$true] %s16_s16 }
   0x4   :  { %s375_s21 = smov 8   ;;  %s376_s22 = smov [#allocation5]  }
   0x5   :  { %22 = dma.hbm_to_vmem [thread:$0]  %s15_s14, 256, %s17_s16, [#allocation4], %s374_s20, %s374_s20, %s375_s21  }
   0x6   :  { %s29_s23 = sshll.u32 %s376_s22, 4  ;;  %s30_s23 = int_to_ptr.vmem [resolvable:$true] %s29_s23 }
   0x7   :  { %35 = dma.hbm_to_vmem [thread:$0]  %s28_s19, 512, %s30_s23, [#allocation6], %s374_s20, %s374_s20, %s375_s21  }
   0x8   :  { %369 = dma.done.wait [#allocation4], 256  }
   0x9   :  { %370 = vsyncadd [#allocation4], 4294967040 }
   0xa   :  { %371 = dma.done.wait [#allocation6], 512  }
   0xb   :  { %372 = vsyncadd [#allocation6], 4294966784  ;;  %vm50_vm0 = vcmask 261120   ;;  %v60_v0 = vld [vmem:[#allocation5 + $0x18] sm:$0xff]  ;;  %v59_v1 = vld [vmem:[#allocation5 + $0x10] sm:$0xff]  ;;  %v377_v38 = vmov 0.0  }
   0xc   :  { %v58_v2 = vld [vmem:[#allocation5 + $0x8] sm:$0xff]  ;;  %v80_v3 = vand.u32 4294901760, %v60_v0  ;;  %v404_v4 = vand.u32 4294901760, %v59_v1  ;;  %v57_v6 = vld [vmem:[#allocation5] sm:$0xff]  ;;  %v56_v7 = vld [vmem:[#allocation3 + $0x8] sm:$0xff]  ;;  %51 = vst.msk [vmem:[#allocation2] sm:$0xff] %vm50_vm0, %v377_v38 }
   0xd   :  { %v406_v5 = vand.u32 4294901760, %v58_v2  ;;  %v55_v8 = vld [vmem:[#allocation3] sm:$0xff]  ;;  %v408_v9 = vand.u32 4294901760, %v57_v6  ;;  %v66_v10 = vsel %vm50_vm0, %v56_v7, 0  ;;  %52 = vst.msk [vmem:[#allocation2 + $0x8] sm:$0xff] %vm50_vm0, %v377_v38 }
   0xe   :  { %v63_v11 = vsel %vm50_vm0, %v55_v8, 0  ;;  %307 = vmatpush.msra.mxu2 %v80_v3  ;;  %v118_v12 = vsub.f32 %v60_v0, %v80_v3  ;;  %v412_v13 = vand.u32 4294901760, %v66_v10  ;;  %v124_v14 = vsub.f32 %v59_v1, %v404_v4  ;;  %81 = vmatpush.msra.mxu0 %v80_v3  ;;  %v320_v63 = vld [vmem:[%s450_s2] ss:$0 sm:$0xff] }
   0xf   :  { %v130_v15 = vsub.f32 %v58_v2, %v406_v5  ;;  %v136_v16 = vsub.f32 %v57_v6, %v408_v9  ;;  %v88_v17 = vand.u32 4294901760, %v63_v11 }
  0x10   :  { %308 = vmatpush.msra.mxu2 %v404_v4  ;;  %v119_v18 = vand.u32 4294901760, %v118_v12  ;;  %v97_v19 = vsub.f32 %v66_v10, %v412_v13  ;;  %v125_v20 = vand.u32 4294901760, %v124_v14  ;;  %83 = vmatpush.msra.mxu0 %v404_v4 }
  0x11   :  { %v131_v21 = vand.u32 4294901760, %v130_v15  ;;  %v137_v22 = vand.u32 4294901760, %v136_v16  ;;  %v89_v23 = vsub.f32 %v63_v11, %v88_v17 }
  0x12   :  { %309 = vmatpush.msra.mxu2 %v406_v5  ;;  %v120_v24 = vsub.f32 %v118_v12, %v119_v18  ;;  %v98_v25 = vand.u32 4294901760, %v97_v19  ;;  %v126_v26 = vsub.f32 %v124_v14, %v125_v20  ;;  %85 = vmatpush.msra.mxu0 %v406_v5 }
  0x13   :  { %v132_v27 = vsub.f32 %v130_v15, %v131_v21  ;;  %v90_v28 = vand.u32 4294901760, %v89_v23  ;;  %v138_v32 = vsub.f32 %v136_v16, %v137_v22  ;;  %v53_v52 = vld [vmem:[#allocation2] sm:$0xff] }
  0x14   :  { %310 = vmatpush.msra.mxu2 %v408_v9  ;;  %v121_v29 = vand.u32 4294901760, %v120_v24  ;;  %v99_v30 = vsub.f32 %v97_v19, %v98_v25  ;;  %v127_v31 = vand.u32 4294901760, %v126_v26  ;;  %87 = vmatpush.msra.mxu0 %v408_v9  ;;  %v54_v62 = vld [vmem:[#allocation2 + $0x8] sm:$0xff] }
  0x15   :  { %v91_v33 = vsub.f32 %v89_v23, %v90_v28  ;;  %v133_v35 = vand.u32 4294901760, %v132_v27  ;;  %v139_v37 = vand.u32 4294901760, %v138_v32 }
  0x16   :  { %164 = vmatpush.msrb.mxu2 %v118_v12  ;;  %233 = vmatpush.msrb.mxu0 %v119_v18  ;;  %v100_v34 = vand.u32 4294901760, %v99_v30 }
  0x17   :  { %311 = vmatpush.msra.mxu3 %v121_v29  ;;  %122 = vmatpush.msra.mxu1 %v121_v29  ;;  %v92_v36 = vand.u32 4294901760, %v91_v33 }
  0x18   :  { %167 = vmatpush.msrb.mxu2 %v124_v14  ;;  %237 = vmatpush.msrb.mxu0 %v125_v20 }
  0x19   :  { %101 = vmatmul.f32.vlgmr.msra.gmra.mxu2 %v100_v34  ;;  %312 = vmatpush.msra.mxu3 %v127_v31 }
  0x1a   :  { %170 = vmatpush.msrb.mxu2 %v130_v15  ;;  %128 = vmatpush.msra.mxu1 %v127_v31 }
  0x1b   :  { %313 = vmatpush.msra.mxu3 %v133_v35  ;;  %93 = vmatmul.f32.vlgmr.msra.gmra.mxu0 %v92_v36 }
  0x1c   :  { %173 = vmatpush.msrb.mxu2 %v136_v16  ;;  %134 = vmatpush.msra.mxu1 %v133_v35 }
  0x1d   :  { %314 = vmatpush.msra.mxu3 %v139_v37  ;;  %241 = vmatpush.msrb.mxu0 %v131_v21 }
  0x1e   :  { %146 = vmatmul.f32.vlgmr.msra.gmra.mxu3 %v412_v13  ;;  %140 = vmatpush.msra.mxu1 %v139_v37 }
  0x1f   :  { %198 = vmatpush.msrb.mxu3 %v80_v3  ;;  %142 = vmatmul.f32.vlgmr.msra.gmra.mxu1 %v88_v17 }
  0x20   :  { %268 = vmatpush.msrb.mxu1 %v80_v3  ;;  %245 = vmatpush.msrb.mxu0 %v137_v22 }
  0x21   :  { %176 = vmatmul.f32.vlgmr.msrb.gmra.mxu2 %v89_v23  ;;  %200 = vmatpush.msrb.mxu3 %v404_v4 }
  0x22   :  { %270 = vmatpush.msrb.mxu1 %v404_v4 }
  0x23   :  { %202 = vmatpush.msrb.mxu3 %v406_v5  ;;  %247 = vmatmul.f32.vlgmr.msrb.gmra.mxu0 %v88_v17 }
  0x24   :  { %272 = vmatpush.msrb.mxu1 %v406_v5 }
  0x25   :  { %204 = vmatpush.msrb.mxu3 %v408_v9 }
  0x26   :  { %208 = vmatmul.f32.vlgmr.msrb.gmra.mxu3 %v90_v28  ;;  %274 = vmatpush.msrb.mxu1 %v408_v9 }
  0x27   :  { %276 = vmatmul.f32.vlgmr.msrb.gmra.mxu1 %v88_v17 }
  0x29   :  { %181 = vmatmul.f32.gmra.mxu2 %v97_v19 }
  0x2b   :  { %251 = vmatmul.f32.gmra.mxu0 %v412_v13 }
  0x2e   :  { %214 = vmatmul.f32.gmra.mxu3 %v98_v25 }
  0x2f   :  { %280 = vmatmul.f32.gmra.mxu1 %v412_v13 }
  0x98   :  { %v94_v40 = vpop.f32.mrf.mxu0 }
  0x9c   :  { %v102_v39 = vpop.f32.mrf.mxu2  ;;  %v143_v42 = vpop.f32.mrf.mxu1 }
  0x9d   :  { %v144_v43 = vadd.f32 %v143_v42, %v94_v40 }
  0xa0   :  { %v248_v45 = vpop.f32.mrf.mxu0 }
  0xa1   :  { %v147_v41 = vpop.f32.mrf.mxu3 }
  0xa2   :  { %v148_v53 = vadd.f32 %v147_v41, %v102_v39 }
  0xa4   :  { %v177_v44 = vpop.f32.mrf.mxu2  ;;  %v277_v48 = vpop.f32.mrf.mxu1 }
  0xa5   :  { %v178_v46 = vadd.f32 %v177_v44, %v144_v43 }
  0xa8   :  { %v252_v58 = vpop.f32.mrf.mxu0 }
  0xa9   :  { %v209_v47 = vpop.f32.mrf.mxu3 }
  0xaa   :  { %v210_v49 = vadd.f32 %v209_v47, %v178_v46 }
  0xac   :  { %v249_v50 = vadd.f32 %v248_v45, %v210_v49  ;;  %v182_v51 = vpop.f32.mrf.mxu2  ;;  %v281_v60 = vpop.f32.mrf.mxu1 }
  0xad   :  { %v183_v55 = vadd.f32 %v182_v51, %v148_v53 }
  0xae   :  { %v278_v54 = vadd.f32 %v277_v48, %v249_v50 }
  0xb0   :  { %v284_v56 = vadd.f32 %v278_v54, %v53_v52 }
  0xb1   :  { %v215_v57 = vpop.f32.mrf.mxu3 }
  0xb2   :  { %286 = vst.msk [vmem:[#allocation2] sm:$0xff] %vm50_vm0, %v284_v56  ;;  %v216_v59 = vadd.f32 %v215_v57, %v183_v55 }
  0xb4   :  { %v253_v61 = vadd.f32 %v252_v58, %v216_v59 }
  0xb6   :  { %v282_v0 = vadd.f32 %v281_v60, %v253_v61 }
  0xb8   :  { %v285_v1 = vadd.f32 %v282_v0, %v54_v62 }
  0xb9   :  { %v291_v2 = vld [vmem:[#allocation2] sm:$0xff] }
  0xba   :  { %v297_v3 = vadd.f32 %v320_v63, %v291_v2  ;;  %287 = vst.msk [vmem:[#allocation2 + $0x8] sm:$0xff] %vm50_vm0, %v285_v1 }
  0xbc   :  { %299 = vst.msk [vmem:[%s451_s3] sm:$0xff] %vm50_vm0, %v297_v3 }
  0xc1   :  { %v292_v4 = vld [vmem:[#allocation2 + $0x8] sm:$0xff] }
  0xc2   :  { %v298_v5 = vadd.f32 %v320_v63, %v292_v4 }
  0xc4   :  { %300 = vst.msk [vmem:[%s451_s3 + $0x8] sm:$0xff] %vm50_vm0, %v298_v5 }
  0xc5   :  { %305 = vsyncpa [#allocation4], 1 }
  0xc6   :  { %306 = vsyncpa [#allocation6], 1 }

// kernel: transformer_layer.13
= control target key start
LH: loop header
LB: loop body
LE: loop exit
PB: predicated region body
PF: predicated region fallthrough
CT: control target
= control target key end

     0   :  { %vm18_vm0 = vcmask 261120   ;;  %v283_v38 = vmov 0.0   ;;  %s366_s1 = inlined_call_operand.vmem [shape: f32[32,32], index: 1, kind: input, shape index: {}]   ;;  %s367_s0 = inlined_call_operand.vmem [shape: f32[16,32], index: 0, kind: input, shape index: {}]   ;;  %s368_s2 = inlined_call_operand.vmem [shape: f32[1,32], index: 2, kind: input, shape index: {}]   ;;  %s369_s3 = inlined_call_operand.vmem [shape: f32[16,32], index: 3, kind: output, shape index: {}]  }
   0x1   :  { %v28_v0 = vld [vmem:[%s366_s1 + $0x18] sm:$0xff]  ;;  %v27_v1 = vld [vmem:[%s366_s1 + $0x10] sm:$0xff]  ;;  %v26_v2 = vld [vmem:[%s366_s1 + $0x8] sm:$0xff]  ;;  %19 = vst.msk [vmem:[#allocation2] sm:$0xff] %vm18_vm0, %v283_v38 }
   0x2   :  { %v48_v3 = vand.u32 4294901760, %v28_v0  ;;  %v313_v4 = vand.u32 4294901760, %v27_v1  ;;  %v315_v5 = vand.u32 4294901760, %v26_v2  ;;  %v25_v6 = vld [vmem:[%s366_s1] sm:$0xff]  ;;  %v24_v7 = vld [vmem:[%s367_s0 + $0x8] sm:$0xff]  ;;  %20 = vst.msk [vmem:[#allocation2 + $0x8] sm:$0xff] %vm18_vm0, %v283_v38 }
   0x3   :  { %v23_v8 = vld [vmem:[%s367_s0] sm:$0xff]  ;;  %v326_v9 = vand.u32 4294901760, %v25_v6  ;;  %v34_v10 = vsel %vm18_vm0, %v24_v7, 0 }
   0x4   :  { %v31_v11 = vsel %vm18_vm0, %v23_v8, 0  ;;  %273 = vmatpush.msra.mxu2 %v48_v3  ;;  %v86_v12 = vsub.f32 %v28_v0, %v48_v3  ;;  %v330_v13 = vand.u32 4294901760, %v34_v10  ;;  %v92_v14 = vsub.f32 %v27_v1, %v313_v4  ;;  %49 = vmatpush.msra.mxu0 %v48_v3  ;;  %v282_v63 = vld [vmem:[%s368_s2] ss:$0 sm:$0xff] }
   0x5   :  { %v98_v15 = vsub.f32 %v26_v2, %v315_v5  ;;  %v104_v16 = vsub.f32 %v25_v6, %v326_v9  ;;  %v56_v17 = vand.u32 4294901760, %v31_v11 }
   0x6   :  { %274 = vmatpush.msra.mxu2 %v313_v4  ;;  %v87_v18 = vand.u32 4294901760, %v86_v12  ;;  %v65_v19 = vsub.f32 %v34_v10, %v330_v13  ;;  %v93_v20 = vand.u32 4294901760, %v92_v14  ;;  %51 = vmatpush.msra.mxu0 %v313_v4 }
   0x7   :  { %v99_v21 = vand.u32 4294901760, %v98_v15  ;;  %v105_v22 = vand.u32 4294901760, %v104_v16  ;;  %v57_v23 = vsub.f32 %v31_v11, %v56_v17 }
   0x8   :  { %275 = vmatpush.msra.mxu2 %v315_v5  ;;  %v88_v24 = vsub.f32 %v86_v12, %v87_v18  ;;  %v66_v25 = vand.u32 4294901760, %v65_v19  ;;  %v94_v26 = vsub.f32 %v92_v14, %v93_v20  ;;  %53 = vmatpush.msra.mxu0 %v315_v5  ;;  %v21_v52 = vld [vmem:[#allocation2] sm:$0xff] }
   0x9   :  { %v100_v27 = vsub.f32 %v98_v15, %v99_v21  ;;  %v58_v28 = vand.u32 4294901760, %v57_v23  ;;  %v106_v32 = vsub.f32 %v104_v16, %v105_v22  ;;  %v22_v62 = vld [vmem:[#allocation2 + $0x8] sm:$0xff] }
   0xa   :  { %276 = vmatpush.msra.mxu2 %v326_v9  ;;  %v89_v29 = vand.u32 4294901760, %v88_v24  ;;  %v67_v30 = vsub.f32 %v65_v19, %v66_v25  ;;  %v95_v31 = vand.u32 4294901760, %v94_v26  ;;  %55 = vmatpush.msra.mxu0 %v326_v9 }
   0xb   :  { %v59_v33 = vsub.f32 %v57_v23, %v58_v28  ;;  %v101_v35 = vand.u32 4294901760, %v100_v27  ;;  %v107_v37 = vand.u32 4294901760, %v106_v32 }
   0xc   :  { %132 = vmatpush.msrb.mxu2 %v86_v12  ;;  %201 = vmatpush.msrb.mxu0 %v87_v18  ;;  %v68_v34 = vand.u32 4294901760, %v67_v30 }
   0xd   :  { %277 = vmatpush.msra.mxu3 %v89_v29  ;;  %90 = vmatpush.msra.mxu1 %v89_v29  ;;  %v60_v36 = vand.u32 4294901760, %v59_v33 }
   0xe   :  { %135 = vmatpush.msrb.mxu2 %v92_v14  ;;  %205 = vmatpush.msrb.mxu0 %v93_v20 }
   0xf   :  { %69 = vmatmul.f32.vlgmr.msra.gmra.mxu2 %v68_v34  ;;  %278 = vmatpush.msra.mxu3 %v95_v31 }
  0x10   :  { %138 = vmatpush.msrb.mxu2 %v98_v15  ;;  %96 = vmatpush.msra.mxu1 %v95_v31 }
  0x11   :  { %279 = vmatpush.msra.mxu3 %v101_v35  ;;  %61 = vmatmul.f32.vlgmr.msra.gmra.mxu0 %v60_v36 }
  0x12   :  { %141 = vmatpush.msrb.mxu2 %v104_v16  ;;  %102 = vmatpush.msra.mxu1 %v101_v35 }
  0x13   :  { %280 = vmatpush.msra.mxu3 %v107_v37  ;;  %209 = vmatpush.msrb.mxu0 %v99_v21 }
  0x14   :  { %114 = vmatmul.f32.vlgmr.msra.gmra.mxu3 %v330_v13  ;;  %108 = vmatpush.msra.mxu1 %v107_v37 }
  0x15   :  { %166 = vmatpush.msrb.mxu3 %v48_v3  ;;  %110 = vmatmul.f32.vlgmr.msra.gmra.mxu1 %v56_v17 }
  0x16   :  { %236 = vmatpush.msrb.mxu1 %v48_v3  ;;  %213 = vmatpush.msrb.mxu0 %v105_v22 }
  0x17   :  { %144 = vmatmul.f32.vlgmr.msrb.gmra.mxu2 %v57_v23  ;;  %168 = vmatpush.msrb.mxu3 %v313_v4 }
  0x18   :  { %238 = vmatpush.msrb.mxu1 %v313_v4 }
  0x19   :  { %170 = vmatpush.msrb.mxu3 %v315_v5  ;;  %215 = vmatmul.f32.vlgmr.msrb.gmra.mxu0 %v56_v17 }
  0x1a   :  { %240 = vmatpush.msrb.mxu1 %v315_v5 }
  0x1b   :  { %172 = vmatpush.msrb.mxu3 %v326_v9 }
  0x1c   :  { %176 = vmatmul.f32.vlgmr.msrb.gmra.mxu3 %v58_v28  ;;  %242 = vmatpush.msrb.mxu1 %v326_v9 }
  0x1d   :  { %244 = vmatmul.f32.vlgmr.msrb.gmra.mxu1 %v56_v17 }
  0x1f   :  { %149 = vmatmul.f32.gmra.mxu2 %v65_v19 }
  0x21   :  { %219 = vmatmul.f32.gmra.mxu0 %v330_v13 }
  0x24   :  { %182 = vmatmul.f32.gmra.mxu3 %v66_v25 }
  0x25   :  { %248 = vmatmul.f32.gmra.mxu1 %v330_v13 }
  0x8e   :  { %v62_v40 = vpop.f32.mrf.mxu0 }
  0x92   :  { %v70_v39 = vpop.f32.mrf.mxu2  ;;  %v111_v42 = vpop.f32.mrf.mxu1 }
  0x93   :  { %v112_v43 = vadd.f32 %v111_v42, %v62_v40 }
  0x96   :  { %v216_v45 = vpop.f32.mrf.mxu0 }
  0x97   :  { %v115_v41 = vpop.f32.mrf.mxu3 }
  0x98   :  { %v116_v53 = vadd.f32 %v115_v41, %v70_v39 }
  0x9a   :  { %v145_v44 = vpop.f32.mrf.mxu2  ;;  %v245_v48 = vpop.f32.mrf.mxu1 }
  0x9b   :  { %v146_v46 = vadd.f32 %v145_v44, %v112_v43 }
  0x9e   :  { %v220_v58 = vpop.f32.mrf.mxu0 }
  0x9f   :  { %v177_v47 = vpop.f32.mrf.mxu3 }
  0xa0   :  { %v178_v49 = vadd.f32 %v177_v47, %v146_v46 }
  0xa2   :  { %v217_v50 = vadd.f32 %v216_v45, %v178_v49  ;;  %v150_v51 = vpop.f32.mrf.mxu2  ;;  %v249_v60 = vpop.f32.mrf.mxu1 }
  0xa3   :  { %v151_v55 = vadd.f32 %v150_v51, %v116_v53 }
  0xa4   :  { %v246_v54 = vadd.f32 %v245_v48, %v217_v50 }
  0xa6   :  { %v252_v56 = vadd.f32 %v246_v54, %v21_v52 }
  0xa7   :  { %v183_v57 = vpop.f32.mrf.mxu3 }
  0xa8   :  { %254 = vst.msk [vmem:[#allocation2] sm:$0xff] %vm18_vm0, %v252_v56  ;;  %v184_v59 = vadd.f32 %v183_v57, %v151_v55 }
  0xaa   :  { %v221_v61 = vadd.f32 %v220_v58, %v184_v59 }
  0xac   :  { %v250_v0 = vadd.f32 %v249_v60, %v221_v61 }
  0xae   :  { %v253_v1 = vadd.f32 %v250_v0, %v22_v62 }
  0xaf   :  { %v259_v2 = vld [vmem:[#allocation2] sm:$0xff] }
  0xb0   :  { %v265_v3 = vadd.f32 %v282_v63, %v259_v2  ;;  %255 = vst.msk [vmem:[#allocation2 + $0x8] sm:$0xff] %vm18_vm0, %v253_v1 }
  0xb2   :  { %267 = vst.msk [vmem:[%s369_s3] sm:$0xff] %vm18_vm0, %v265_v3 }
  0xb7   :  { %v260_v4 = vld [vmem:[#allocation2 + $0x8] sm:$0xff] }
  0xb8   :  { %v266_v5 = vadd.f32 %v282_v63, %v260_v4 }
  0xba   :  { %268 = vst.msk [vmem:[%s369_s3 + $0x8] sm:$0xff] %vm18_vm0, %v266_v5 }

// kernel: transformer_layer.14
= control target key start
LH: loop header
LB: loop body
LE: loop exit
PB: predicated region body
PF: predicated region fallthrough
CT: control target
= control target key end

     0   :  { %vm23_vm0 = vcmask 261120   ;;  %v102_v8 = vmov 32.0   ;;  %s158_s0 = inlined_call_operand.vmem [shape: f32[16,32], index: 0, kind: input, shape index: {}]   ;;  %s159_s1 = inlined_call_operand.vmem [shape: f32[16,32], index: 1, kind: input, shape index: {}]   ;;  %s160_s2 = inlined_call_operand.vmem [shape: f32[1,32], index: 2, kind: input, shape index: {}]   ;;  %s161_s3 = inlined_call_operand.vmem [shape: f32[1,32], index: 3, kind: input, shape index: {}]   ;;  %s162_s4 = inlined_call_operand.vmem [shape: f32[16,32], index: 4, kind: output, shape index: {}]  }
   0x1   :  { %v17_v0 = vld [vmem:[%s158_s0] sm:$0xff]  ;;  %v18_v3 = vld [vmem:[%s158_s0 + $0x8] sm:$0xff]  ;;  %96 = vrcp.f32 %v102_v8 }
   0x2   :  { %v19_v1 = vld [vmem:[%s159_s1] sm:$0xff]  ;;  %v20_v4 = vld [vmem:[%s159_s1 + $0x8] sm:$0xff] }
   0x3   :  { %v21_v2 = vadd.f32 %v19_v1, %v17_v0  ;;  %v22_v6 = vadd.f32 %v20_v4, %v18_v3  ;;  %v94_v37 = vld [vmem:[%s160_s2] ss:$0 sm:$0xff] }
   0x4   :  { %v95_v42 = vld [vmem:[%s161_s3] ss:$0 sm:$0xff] }
   0x5   :  { %v24_v5 = vsel %vm23_vm0, %v21_v2, 0.0  ;;  %v27_v7 = vsel %vm23_vm0, %v22_v6, 0.0 }
   0x6   :  { %25 = vadd.xlane.f32.xlu0 %v24_v5 }
   0x7   :  { %v97_v9 = vpop.eup %96 }
   0x8   :  { %v31_v10 = vmul.f32 32.0, %v97_v9  ;;  %vm35_vm1 = vweird.f32 %v97_v9 }
   0xa   :  { %v32_v11 = vsub.f32 1.0, %v31_v10 }
   0xc   :  { %v33_v12 = vmul.f32 %v97_v9, %v32_v11 }
   0xe   :  { %28 = vadd.xlane.f32.xlu0 %v27_v7  ;;  %v34_v13 = vadd.f32 %v97_v9, %v33_v12 }
  0x10   :  { %v36_v14 = vsel %vm35_vm1, %v97_v9, %v34_v13 }
  0x79   :  { %v26_v15 = vpop.xlane.xlu0 %25 }
  0x7a   :  { %v37_v16 = vmul.f32 %v36_v14, %v26_v15 }
  0x7c   :  { %v39_v17 = vsub.f32 %v21_v2, %v37_v16 }
  0x7e   :  { %v41_v18 = vmul.f32 %v39_v17, %v39_v17 }
  0x80   :  { %v43_v19 = vsel %vm23_vm0, %v41_v18, 0.0 }
  0x81   :  { %44 = vadd.xlane.f32.xlu1 %v43_v19  ;;  %v29_v20 = vpop.xlane.xlu0 %28 }
  0x82   :  { %v38_v21 = vmul.f32 %v36_v14, %v29_v20 }
  0x84   :  { %v40_v22 = vsub.f32 %v22_v6, %v38_v21 }
  0x86   :  { %v42_v23 = vmul.f32 %v40_v22, %v40_v22 }
  0x88   :  { %v46_v24 = vsel %vm23_vm0, %v42_v23, 0.0 }
  0x89   :  { %47 = vadd.xlane.f32.xlu1 %v46_v24 }
  0xf4   :  { %v45_v25 = vpop.xlane.xlu1 %44 }
  0xf5   :  { %v49_v26 = vmul.f32 %v45_v25, %v36_v14 }
  0xf7   :  { %v51_v27 = vadd.f32 1e-05, %v49_v26 }
  0xf9   :  { %98 = vrsqrt.f32 %v51_v27  ;;  %vm59_vm3 = vweird.f32 %v51_v27 }
  0xfc   :  { %v48_v28 = vpop.xlane.xlu1 %47 }
  0xfd   :  { %v50_v29 = vmul.f32 %v48_v28, %v36_v14 }
  0xff   :  { %v99_v30 = vpop.eup %98  ;;  %v52_v31 = vadd.f32 1e-05, %v50_v29 }
 0x100   :  { %v54_v32 = vmul.f32 %v99_v30, %v51_v27  ;;  %vm60_vm2 = vweird.f32 %v99_v30 }
 0x101   :  { %100 = vrsqrt.f32 %v52_v31  ;;  %vm61_vm4 = vmor %vm59_vm3, %vm60_vm2  ;;  %vm69_vm6 = vweird.f32 %v52_v31 }
 0x102   :  { %v55_v33 = vmul.f32 %v99_v30, %v54_v32 }
 0x104   :  { %v56_v34 = vmul.f32 0.5, %v55_v33 }
 0x106   :  { %v57_v35 = vsub.f32 1.5, %v56_v34 }
 0x107   :  { %v101_v36 = vpop.eup %100 }
 0x108   :  { %v58_v38 = vmul.f32 %v99_v30, %v57_v35  ;;  %v64_v39 = vmul.f32 %v101_v36, %v52_v31  ;;  %vm70_vm5 = vweird.f32 %v101_v36 }
 0x109   :  { %vm71_vm7 = vmor %vm69_vm6, %vm70_vm5 }
 0x10a   :  { %v62_v40 = vsel %vm61_vm4, %v99_v30, %v58_v38  ;;  %v65_v41 = vmul.f32 %v101_v36, %v64_v39 }
 0x10b   :  { %v77_v43 = vmul.f32 %v94_v37, %v62_v40 }
 0x10c   :  { %v66_v44 = vmul.f32 0.5, %v65_v41 }
 0x10d   :  { %v79_v45 = vmul.f32 %v77_v43, %v39_v17 }
 0x10e   :  { %v67_v46 = vsub.f32 1.5, %v66_v44 }
 0x10f   :  { %v85_v47 = vadd.f32 %v95_v42, %v79_v45 }
 0x110   :  { %v68_v48 = vmul.f32 %v101_v36, %v67_v46 }
 0x111   :  { %87 = vst.msk [vmem:[%s162_s4] sm:$0xff] %vm23_vm0, %v85_v47 }
 0x112   :  { %v72_v49 = vsel %vm71_vm7, %v101_v36, %v68_v48 }
 0x113   :  { %v78_v50 = vmul.f32 %v94_v37, %v72_v49 }
 0x115   :  { %v80_v51 = vmul.f32 %v78_v50, %v40_v22 }
 0x117   :  { %v86_v52 = vadd.f32 %v95_v42, %v80_v51 }
 0x119   :  { %88 = vst.msk [vmem:[%s162_s4 + $0x8] sm:$0xff] %vm23_vm0, %v86_v52 }

// kernel: transformer_layer.12
= control target key start
LH: loop header
LB: loop body
LE: loop exit
PB: predicated region body
PF: predicated region fallthrough
CT: control target
= control target key end

     0   :  { %10 = vsyncpa [#allocation3], 0  ;;  %s956_s0 = inlined_call_operand.vmem [shape: f32[8,8,8], index: 0, kind: input, shape index: {}]   ;;  %s957_s1 = inlined_call_operand.vmem [shape: f32[8,8,8], index: 1, kind: input, shape index: {}]   ;;  %s958_s2 = inlined_call_operand.vmem [shape: f32[8,8,8], index: 2, kind: input, shape index: {}]   ;;  %s959_s3 = inlined_call_operand.vmem [shape: f32[8,8,8], index: 3, kind: output, shape index: {0}]   ;;  %s960_s4 = inlined_call_operand.hbm [shape: f32[8,8,8], index: 4, kind: output, shape index: {1}]  }
   0x1   :  { %12 = vsyncpa [#allocation3 + $0x1], 0  ;;  %s845_s15 = smov 0   ;;  %s847_s16 = smov 0  }
   0x2   :  { %s849_s17 = smov 0   ;;  %s851_s18 = smov 0  }
   0x3 LB: > { %s866_s19 = sadd.s32 4294967295, %s818_s18   ;;  %s700_s20 = sadd.s32 4294967294, %s818_s18   ;;  %s818_s18 = sphi %s851_s18, %s966_s18   ;;  %s814_s17 = sphi %s849_s17, %s965_s17   ;;  %s810_s16 = sphi %s847_s16, %s964_s16   ;;  %s806_s15 = sphi %s845_s15, %s963_s15  }
   0x4   : > { %s870_s21 = sadd.s32 1, %s818_s18   ;;  %s129_s22 = sadd.s32 1, %s814_s17 }
   0x5   : > { %s126_s23 = ssub.s32 %s818_s18, %s870_s21  ;;  %p139_p0 = scmp.ne.s32.totalorder %s814_s17, %s810_s16 }
   0x6   : > { %p127_p1 = scmp.eq.s32.totalorder %s126_s23, 0  ;;  %p140_p2 = scmp.eq.s32.totalorder %s866_s19, 7 }
   0x7   : > { %p145_p3 = scmp.ne.s32.totalorder %s810_s16, %s806_s15  ;;  %p146_p4 = scmp.eq.s32.totalorder %s700_s20, 7 }
   0x8   : > { %s881_s24 = scalar_select %p127_p1, %s814_s17, %s129_s22  }
   0x9   : > { %p883_p5 = por %p140_p2, %p139_p0  ;;  %p887_p6 = por %p146_p4, %p145_p3 }
   0xa   : > { %p703_p7 = scmp.ge.s32.totalorder %s818_s18, 1  ;;  %p185_p8 = scmp.lt.s32.totalorder %s818_s18, 9 }
   0xc   : > { %p186_p9 = pnand %p703_p7, %p185_p8 }
   0xd   : > { %p222_p10 = scmp.lt.s32.totalorder (!%p186_p9), %s866_s19, 7  ;;  %s219_s12 = sand.u32 (!%p186_p9), 1, %s810_s16  }
   0xe   : > { %189 = sbr.rel (%p186_p9) target bundleno = 596 (0x254), region = 32  ;;  %s704_s13 = sshll.u32 (!%p186_p9), %s219_s12, 3 }
   0xf   : > { %s221_s14 = scalar_lea.vmem (!%p186_p9), [#allocation2], %s704_s13  ;;  %s710_s20 = sshll.u32 (!%p186_p9), %s866_s19, 3 }
  0x10   : > { %s590_s29 = sshll.u32 (!%p186_p9), %s221_s14, 4  ;;  %s591_s29 = int_to_ptr.vmem [resolvable:$true] %s590_s29 }
  0x13   : > { %s223_s27 = scalar_select %p222_p10, %s866_s19, 7  ;;  %vm241_vm0 = vcmask 64512  }
  0x14   : > { %s776_s19 = scalar_lea.hbm %s960_s4, 64 }
  0x15   : > { %s895_s28 = sshll.u32 %s223_s27, 3  ;;  %s588_s27 = scalar_lea.hbm %s960_s4, %s710_s20 }
  0x16   : > { %s229_s5 = scalar_lea.vmem %s957_s1, %s895_s28  ;;  %s225_s8 = scalar_lea.vmem %s956_s0, %s895_s28 }
  0x17   : > { %v239_v0 = vld [vmem:[%s229_s5] sm:$0xff]  ;;  %s233_s11 = scalar_lea.vmem %s958_s2, %s895_s28  ;;  %s592_s30 = sshll.u32 %s588_s27, 4  ;;  %s593_s30 = int_to_ptr.hbm [resolvable:$true] %s592_s30 }
  0x18   : > { %v238_v1 = vld [vmem:[%s225_s8] sm:$0xff]  ;;  %v246_v2 = vsel %vm241_vm0, %v239_v0, 0  ;;  %s575_s5 = scalar_lea.sflag [#allocation3], %s219_s12  ;;  %s770_s6 = sshra.s32 %s593_s30, 4  ;;  %s771_s6 = int_to_ptr.hbm [resolvable:$true] %s770_s6 }
  0x19   : > { %v243_v3 = vsel %vm241_vm0, %v238_v1, 0  ;;  %v263_v4 = vand.u32 4294901760, %v246_v2  ;;  %v240_v32 = vld [vmem:[%s233_s11] sm:$0xff]  ;;  %s772_s7 = scalar_lea.hbm %s771_s6, 8  ;;  %p777_p0 = scmp.lt.s32.totalorder %s771_s6, %s960_s4 }
  0x1a   : > { %v265_v5 = vand.u32 4294901760, %v243_v3  ;;  %v437_v33 = vand.u32 4294901760, %v240_v32  ;;  %p773_p11 = scmp.ne.s32.totalorder %s771_s6, %s772_s7  ;;  %p778_p1 = scmp.lt.s32.totalorder %s776_s19, %s772_s7 }
  0x1b   : > { %v290_v6 = vsub.f32 %v246_v2, %v263_v4  ;;  %264 = vmatpush.xpose.msra.mxu0 %v263_v4  ;;  %340 = vmatpush.xpose.msra.mxu3 %v263_v4 }
  0x1c   : > { %v266_v7 = vsub.f32 %v243_v3, %v265_v5  ;;  %v464_v34 = vsub.f32 %v240_v32, %v437_v33  ;;  %p774_p12 = pnand %p773_p11, %p883_p5  ;;  %p779_p2 = por %p778_p1, %p777_p0 }
  0x1d   : > { %317 = vmatpush.xpose.msra.mxu2 %v290_v6  ;;  %v291_v8 = vand.u32 4294901760, %v290_v6 }
  0x1e   : > { %v267_v9 = vand.u32 4294901760, %v266_v7  ;;  %v465_v35 = vand.u32 4294901760, %v464_v34  ;;  %p775_p13 = pneg %p774_p12 }
  0x1f   : > { %v292_v10 = vsub.f32 %v290_v6, %v291_v8  ;;  %366 = vmatpush.xpose.msrb.mxu0 %v291_v8 }
  0x20   : > { %v268_v11 = vsub.f32 %v266_v7, %v267_v9  ;;  %344 = vmatmul.f32.vlgmr.msra.gmra.mxu3 %v267_v9  ;;  %320 = vmatmul.f32.vlgmr.msra.gmra.mxu2 %v266_v7  ;;  %v466_v36 = vsub.f32 %v464_v34, %v465_v35  ;;  %p780_p3 = pnand %p779_p2, %p775_p13 }
  0x21   : > { %v293_v12 = vand.u32 4294901760, %v292_v10  ;;  %438 = vmatpush.msrb.mxu2 %v437_v33 }
  0x22   : > { %v269_v13 = vand.u32 4294901760, %v268_v11  ;;  %v467_v37 = vand.u32 4294901760, %v466_v36 }
  0x23   : > { %294 = vmatpush.xpose.msra.mxu1 %v293_v12  ;;  %540 = vmatpush.msra.mxu2 %v465_v35 }
  0x24   : > { %270 = vmatmul.f32.vlgmr.msra.gmra.mxu0 %v269_v13  ;;  %468 = vmatpush.msrb.mxu3 %v467_v37 }
  0x25   : > { %491 = vmatpush.msra.mxu0 %v464_v34 }
  0x26   : > { %296 = vmatmul.f32.vlgmr.msra.gmra.mxu1 %v265_v5  ;;  %562 = vmatpush.msra.mxu3 %v437_v33 }
  0x27   : > { %388 = vmatpush.xpose.msrb.mxu1 %v263_v4 }
  0x2b   : > { %514 = vmatpush.msra.mxu1 %v437_v33 }
  0x2c   : > { %368 = vmatmul.f32.vlgmr.msrb.gmra.mxu0 %v265_v5 }
  0x2e   : > { %390 = vmatmul.f32.vlgmr.msrb.gmra.mxu1 %v265_v5 }
  0xa1   : > { %v271_v14 = vpop.f32.mrf.mxu0 }
  0xa3   : > { %v297_v15 = vpop.f32.mrf.mxu1  ;;  %v321_v16 = vpop.f32.mrf.mxu2 }
  0xa4   : > { %v298_v17 = vadd.f32 %v297_v15, %v271_v14  ;;  %v345_v18 = vpop.f32.mrf.mxu3 }
  0xa6   : > { %v322_v19 = vadd.f32 %v321_v16, %v298_v17 }
  0xa8   : > { %v346_v20 = vadd.f32 %v345_v18, %v322_v19 }
  0xa9   : > { %v369_v21 = vpop.f32.mrf.mxu0 }
  0xaa   : > { %v370_v22 = vadd.f32 %v369_v21, %v346_v20 }
  0xab   : > { %v391_v23 = vpop.f32.mrf.mxu1 }
  0xac   : > { %v392_v24 = vadd.f32 %v391_v23, %v370_v22 }
  0xae   : > { %v394_v25 = vmul.f32 0.35355338, %v392_v24 }
  0xb0   : > { %v395_v26 = vsel %vm241_vm0, %v394_v25, -inf }
  0xb1   : > { %396 = vmax.xlane.f32.xlu0 %v395_v26 }
 0x124   : > { %v397_v27 = vpop.xlane.xlu0 %396 }
 0x125   : > { %v398_v28 = vsub.f32 %v394_v25, %v397_v27 }
 0x127   : > { %v399_v29 = vmul.f32 1.442695, %v398_v28 }
 0x129   : > { %752 = vpow2.f32 %v399_v29 }
 0x12f   : > { %v753_v30 = vpop.eup %752 }
 0x130   : > { %v401_v31 = vsel %vm241_vm0, %v753_v30, 0.0 }
 0x131   : > { %402 = vadd.xlane.f32.xlu0 %v401_v31 }
 0x1a4   : > { %v403_v38 = vpop.xlane.xlu0 %402 }
 0x1a5   : > { %754 = vrcp.f32 %v403_v38  ;;  %v415_v42 = vand.u32 2147483648, %v403_v38  ;;  %v413_v44 = vand.u32 2147483647, %v403_v38  ;;  %vm409_vm2 = vweird.f32 %v403_v38 }
 0x1a7   : > { %v416_v46 = vor.u32 1.1754944e-38, %v415_v42  ;;  %vm414_vm4 = vcmp.eq.f32.partialorder %v413_v44, 8.507059e+37 }
 0x1ab   : > { %v755_v39 = vpop.eup %754 }
 0x1ac   : > { %v405_v40 = vmul.f32 %v755_v39, %v403_v38  ;;  %vm410_vm1 = vweird.f32 %v755_v39 }
 0x1ad   : > { %vm411_vm3 = vmor %vm409_vm2, %vm410_vm1 }
 0x1ae   : > { %v406_v41 = vsub.f32 1.0, %v405_v40 }
 0x1b0   : > { %v407_v43 = vmul.f32 %v755_v39, %v406_v41 }
 0x1b2   : > { %v408_v45 = vadd.f32 %v755_v39, %v407_v43 }
 0x1b4   : > { %v412_v47 = vsel %vm411_vm3, %v755_v39, %v408_v45 }
 0x1b5   : > { %v417_v48 = vsel %vm414_vm4, %v416_v46, %v412_v47 }
 0x1b6   : > { %v418_v49 = vmul.f32 %v753_v30, %v417_v48 }
 0x1b8   : > { %v420_v50 = vsel %vm241_vm0, %v418_v49, 0  ;;  %568 = vst.msk [vmem:[%s221_s14] sm:$0xff] %vm241_vm0, %v418_v49 }
 0x1b9   : > { %v439_v51 = vand.u32 4294901760, %v420_v50 }
 0x1bb   : > { %470 = vmatmul.f32.vlgmr.msrb.gmra.mxu3 %v439_v51  ;;  %v440_v52 = vsub.f32 %v420_v50, %v439_v51 }
 0x1bd   : > { %494 = vmatmul.f32.vlgmr.msra.gmra.mxu0 %v440_v52  ;;  %v441_v53 = vand.u32 4294901760, %v440_v52 }
 0x1bf   : > { %518 = vmatmul.f32.vlgmr.msra.gmra.mxu1 %v441_v53  ;;  %v442_v54 = vsub.f32 %v440_v52, %v441_v53 }
 0x1c1   : > { %v443_v55 = vand.u32 4294901760, %v442_v54 }
 0x1c3   : > { %444 = vmatmul.f32.vlgmr.msrb.gmra.mxu2 %v443_v55  ;;  %564 = vmatmul.f32.vlgmr.msra.gmra.mxu3 %v439_v51 }
 0x1cb   : > { %542 = vmatmul.f32.vlgmr.msra.gmra.mxu2 %v439_v51 }
 0x1cc   : > { %783 = shalt.err (!%p780_p3)
}
 0x1cd   : > { %713 = dma.vmem_to_hbm [thread:$0]  (%p883_p5), %s591_s29, 128, %s593_s30, %s575_s5  }
 0x1ce   : > { %s237_s14 = scalar_lea.vmem %s959_s3, %s895_s28 }
 0x23a   : > { %v495_v59 = vpop.f32.mrf.mxu0 }
 0x23c   : > { %v519_v61 = vpop.f32.mrf.mxu1 }
 0x23e   : > { %v471_v56 = vpop.f32.mrf.mxu3 }
 0x246   : > { %v445_v57 = vpop.f32.mrf.mxu2  ;;  %v565_v1 = vpop.f32.mrf.mxu3 }
 0x247   : > { %v472_v58 = vadd.f32 %v471_v56, %v445_v57 }
 0x249   : > { %v496_v60 = vadd.f32 %v495_v59, %v472_v58 }
 0x24b   : > { %v520_v62 = vadd.f32 %v519_v61, %v496_v60 }
 0x24e   : > { %v543_v63 = vpop.f32.mrf.mxu2 }
 0x24f   : > { %v544_v0 = vadd.f32 %v543_v63, %v520_v62 }
 0x251   : > { %v566_v2 = vadd.f32 %v565_v1, %v544_v0 }
 0x253   : > { %569 = vst.msk [vmem:[%s237_s14] sm:$0xff] %vm241_vm0, %v566_v2 }
 0x254 PF: > { %p719_p4 = scmp.ge.s32.totalorder %s818_s18, 2  ;;  %s611_s25 = sand.u32 1, %s806_s15  }
 0x255   : > { %s612_s20 = scalar_lea.sflag [#allocation3], %s611_s25 }
 0x256   : > { %p716_p5 = pnand %p719_p4, %p887_p6 }
 0x258   : > { %p717_p7 = pneg %p716_p5 }
 0x25a   : > { %801 = dma.done.wait (%p717_p7), %s612_s20, 128  }
 0x25b   : > { %803 = vsyncadd (%p717_p7), %s612_s20, 4294967168  ;;  %p15_p8 = scmp.ge.s32.totalorder %s870_s21, 10   ;;  %s963_s15 = smov %s810_s16 }
 0x25c   : > { %s964_s16 = smov %s814_s17  ;;  %s965_s17 = smov %s881_s24 }
 0x25d   : > { %s966_s18 = smov %s870_s21  ;;  %17 = sbr.rel (!%p15_p8) target bundleno = 3 (0x3), region = 85 }
 0x262   :  { %618 = vsyncpa [#allocation3], 1 }
 0x263   :  { %620 = vsyncpa [#allocation3 + $0x1], 1 }

// kernel: transformer_layer.15
= control target key start
LH: loop header
LB: loop body
LE: loop exit
PB: predicated region body
PF: predicated region fallthrough
CT: control target
= control target key end

     0   :  { %vm18_vm0 = vcmask 261120   ;;  %v305_v38 = vmov 0.0   ;;  %s388_s1 = inlined_call_operand.vmem [shape: f32[32,32], index: 1, kind: input, shape index: {}]   ;;  %s389_s0 = inlined_call_operand.vmem [shape: f32[16,32], index: 0, kind: input, shape index: {}]   ;;  %s390_s2 = inlined_call_operand.vmem [shape: f32[1,32], index: 2, kind: input, shape index: {}]   ;;  %s391_s3 = inlined_call_operand.vmem [shape: f32[16,32], index: 3, kind: output, shape index: {}]  }
   0x1   :  { %v28_v0 = vld [vmem:[%s388_s1 + $0x18] sm:$0xff]  ;;  %v27_v1 = vld [vmem:[%s388_s1 + $0x10] sm:$0xff]  ;;  %v26_v2 = vld [vmem:[%s388_s1 + $0x8] sm:$0xff]  ;;  %19 = vst.msk [vmem:[#allocation2] sm:$0xff] %vm18_vm0, %v305_v38 }
   0x2   :  { %v48_v3 = vand.u32 4294901760, %v28_v0  ;;  %v335_v4 = vand.u32 4294901760, %v27_v1  ;;  %v337_v5 = vand.u32 4294901760, %v26_v2  ;;  %v25_v6 = vld [vmem:[%s388_s1] sm:$0xff]  ;;  %v24_v7 = vld [vmem:[%s389_s0 + $0x8] sm:$0xff]  ;;  %20 = vst.msk [vmem:[#allocation2 + $0x8] sm:$0xff] %vm18_vm0, %v305_v38 }
   0x3   :  { %v23_v8 = vld [vmem:[%s389_s0] sm:$0xff]  ;;  %v348_v9 = vand.u32 4294901760, %v25_v6  ;;  %v34_v10 = vsel %vm18_vm0, %v24_v7, 0 }
   0x4   :  { %v31_v11 = vsel %vm18_vm0, %v23_v8, 0  ;;  %291 = vmatpush.msra.mxu2 %v48_v3  ;;  %v86_v12 = vsub.f32 %v28_v0, %v48_v3  ;;  %v352_v13 = vand.u32 4294901760, %v34_v10  ;;  %v92_v14 = vsub.f32 %v27_v1, %v335_v4  ;;  %49 = vmatpush.msra.mxu0 %v48_v3  ;;  %v300_v63 = vld [vmem:[%s390_s2] ss:$0 sm:$0xff] }
   0x5   :  { %v98_v15 = vsub.f32 %v26_v2, %v337_v5  ;;  %v104_v16 = vsub.f32 %v25_v6, %v348_v9  ;;  %v56_v17 = vand.u32 4294901760, %v31_v11 }
   0x6   :  { %292 = vmatpush.msra.mxu2 %v335_v4  ;;  %v87_v18 = vand.u32 4294901760, %v86_v12  ;;  %v65_v19 = vsub.f32 %v34_v10, %v352_v13  ;;  %v93_v20 = vand.u32 4294901760, %v92_v14  ;;  %51 = vmatpush.msra.mxu0 %v335_v4 }
   0x7   :  { %v99_v21 = vand.u32 4294901760, %v98_v15  ;;  %v105_v22 = vand.u32 4294901760, %v104_v16  ;;  %v57_v23 = vsub.f32 %v31_v11, %v56_v17 }
   0x8   :  { %293 = vmatpush.msra.mxu2 %v337_v5  ;;  %v88_v24 = vsub.f32 %v86_v12, %v87_v18  ;;  %v66_v25 = vand.u32 4294901760, %v65_v19  ;;  %v94_v26 = vsub.f32 %v92_v14, %v93_v20  ;;  %53 = vmatpush.msra.mxu0 %v337_v5  ;;  %v21_v52 = vld [vmem:[#allocation2] sm:$0xff] }
   0x9   :  { %v100_v27 = vsub.f32 %v98_v15, %v99_v21  ;;  %v58_v28 = vand.u32 4294901760, %v57_v23  ;;  %v106_v32 = vsub.f32 %v104_v16, %v105_v22  ;;  %v22_v62 = vld [vmem:[#allocation2 + $0x8] sm:$0xff] }
   0xa   :  { %294 = vmatpush.msra.mxu2 %v348_v9  ;;  %v89_v29 = vand.u32 4294901760, %v88_v24  ;;  %v67_v30 = vsub.f32 %v65_v19, %v66_v25  ;;  %v95_v31 = vand.u32 4294901760, %v94_v26  ;;  %55 = vmatpush.msra.mxu0 %v348_v9 }
   0xb   :  { %v59_v33 = vsub.f32 %v57_v23, %v58_v28  ;;  %v101_v35 = vand.u32 4294901760, %v100_v27  ;;  %v107_v37 = vand.u32 4294901760, %v106_v32 }
   0xc   :  { %132 = vmatpush.msrb.mxu2 %v86_v12  ;;  %201 = vmatpush.msrb.mxu0 %v87_v18  ;;  %v68_v34 = vand.u32 4294901760, %v67_v30 }
   0xd   :  { %295 = vmatpush.msra.mxu3 %v89_v29  ;;  %90 = vmatpush.msra.mxu1 %v89_v29  ;;  %v60_v36 = vand.u32 4294901760, %v59_v33 }
   0xe   :  { %135 = vmatpush.msrb.mxu2 %v92_v14  ;;  %205 = vmatpush.msrb.mxu0 %v93_v20 }
   0xf   :  { %69 = vmatmul.f32.vlgmr.msra.gmra.mxu2 %v68_v34  ;;  %296 = vmatpush.msra.mxu3 %v95_v31 }
  0x10   :  { %138 = vmatpush.msrb.mxu2 %v98_v15  ;;  %96 = vmatpush.msra.mxu1 %v95_v31 }
  0x11   :  { %297 = vmatpush.msra.mxu3 %v101_v35  ;;  %61 = vmatmul.f32.vlgmr.msra.gmra.mxu0 %v60_v36 }
  0x12   :  { %141 = vmatpush.msrb.mxu2 %v104_v16  ;;  %102 = vmatpush.msra.mxu1 %v101_v35 }
  0x13   :  { %298 = vmatpush.msra.mxu3 %v107_v37  ;;  %209 = vmatpush.msrb.mxu0 %v99_v21 }
  0x14   :  { %114 = vmatmul.f32.vlgmr.msra.gmra.mxu3 %v352_v13  ;;  %108 = vmatpush.msra.mxu1 %v107_v37 }
  0x15   :  { %166 = vmatpush.msrb.mxu3 %v48_v3  ;;  %110 = vmatmul.f32.vlgmr.msra.gmra.mxu1 %v56_v17 }
  0x16   :  { %236 = vmatpush.msrb.mxu1 %v48_v3  ;;  %213 = vmatpush.msrb.mxu0 %v105_v22 }
  0x17   :  { %144 = vmatmul.f32.vlgmr.msrb.gmra.mxu2 %v57_v23  ;;  %168 = vmatpush.msrb.mxu3 %v335_v4 }
  0x18   :  { %238 = vmatpush.msrb.mxu1 %v335_v4 }
  0x19   :  { %170 = vmatpush.msrb.mxu3 %v337_v5  ;;  %215 = vmatmul.f32.vlgmr.msrb.gmra.mxu0 %v56_v17 }
  0x1a   :  { %240 = vmatpush.msrb.mxu1 %v337_v5 }
  0x1b   :  { %172 = vmatpush.msrb.mxu3 %v348_v9 }
  0x1c   :  { %176 = vmatmul.f32.vlgmr.msrb.gmra.mxu3 %v58_v28  ;;  %242 = vmatpush.msrb.mxu1 %v348_v9 }
  0x1d   :  { %244 = vmatmul.f32.vlgmr.msrb.gmra.mxu1 %v56_v17 }
  0x1f   :  { %149 = vmatmul.f32.gmra.mxu2 %v65_v19 }
  0x21   :  { %219 = vmatmul.f32.gmra.mxu0 %v352_v13 }
  0x24   :  { %182 = vmatmul.f32.gmra.mxu3 %v66_v25 }
  0x25   :  { %248 = vmatmul.f32.gmra.mxu1 %v352_v13 }
  0x8e   :  { %v62_v40 = vpop.f32.mrf.mxu0 }
  0x92   :  { %v70_v39 = vpop.f32.mrf.mxu2  ;;  %v111_v42 = vpop.f32.mrf.mxu1 }
  0x93   :  { %v112_v43 = vadd.f32 %v111_v42, %v62_v40 }
  0x96   :  { %v216_v45 = vpop.f32.mrf.mxu0 }
  0x97   :  { %v115_v41 = vpop.f32.mrf.mxu3 }
  0x98   :  { %v116_v53 = vadd.f32 %v115_v41, %v70_v39 }
  0x9a   :  { %v145_v44 = vpop.f32.mrf.mxu2  ;;  %v245_v48 = vpop.f32.mrf.mxu1 }
  0x9b   :  { %v146_v46 = vadd.f32 %v145_v44, %v112_v43 }
  0x9e   :  { %v220_v58 = vpop.f32.mrf.mxu0 }
  0x9f   :  { %v177_v47 = vpop.f32.mrf.mxu3 }
  0xa0   :  { %v178_v49 = vadd.f32 %v177_v47, %v146_v46 }
  0xa2   :  { %v217_v50 = vadd.f32 %v216_v45, %v178_v49  ;;  %v150_v51 = vpop.f32.mrf.mxu2  ;;  %v249_v60 = vpop.f32.mrf.mxu1 }
  0xa3   :  { %v151_v55 = vadd.f32 %v150_v51, %v116_v53 }
  0xa4   :  { %v246_v54 = vadd.f32 %v245_v48, %v217_v50 }
  0xa6   :  { %v252_v56 = vadd.f32 %v246_v54, %v21_v52 }
  0xa7   :  { %v183_v57 = vpop.f32.mrf.mxu3 }
  0xa8   :  { %254 = vst.msk [vmem:[#allocation2] sm:$0xff] %vm18_vm0, %v252_v56  ;;  %v184_v59 = vadd.f32 %v183_v57, %v151_v55 }
  0xaa   :  { %v221_v61 = vadd.f32 %v220_v58, %v184_v59 }
  0xac   :  { %v250_v0 = vadd.f32 %v249_v60, %v221_v61 }
  0xae   :  { %v253_v1 = vadd.f32 %v250_v0, %v22_v62 }
  0xaf   :  { %v259_v2 = vld [vmem:[#allocation2] sm:$0xff] }
  0xb0   :  { %v265_v3 = vadd.f32 %v300_v63, %v259_v2  ;;  %255 = vst.msk [vmem:[#allocation2 + $0x8] sm:$0xff] %vm18_vm0, %v253_v1 }
  0xb2   :  { %v269_v4 = vmul.f32 0.044715, %v265_v3  ;;  %v267_v17 = vmul.f32 0.5, %v265_v3 }
  0xb4   :  { %v271_v5 = vmul.f32 %v269_v4, %v265_v3 }
  0xb6   :  { %v273_v6 = vmul.f32 %v271_v5, %v265_v3 }
  0xb7   :  { %v260_v7 = vld [vmem:[#allocation2 + $0x8] sm:$0xff] }
  0xb8   :  { %v275_v8 = vadd.f32 %v273_v6, %v265_v3  ;;  %v266_v9 = vadd.f32 %v300_v63, %v260_v7 }
  0xba   :  { %v277_v10 = vmul.f32 0.7978846, %v275_v8  ;;  %v270_v11 = vmul.f32 0.044715, %v266_v9  ;;  %v268_v21 = vmul.f32 0.5, %v266_v9 }
  0xbc   :  { %301 = vtanh.f32 %v277_v10  ;;  %v272_v12 = vmul.f32 %v270_v11, %v266_v9 }
  0xbe   :  { %v274_v13 = vmul.f32 %v272_v12, %v266_v9 }
  0xc0   :  { %v276_v14 = vadd.f32 %v274_v13, %v266_v9 }
  0xc2   :  { %v302_v15 = vpop.eup %301  ;;  %v278_v16 = vmul.f32 0.7978846, %v276_v14 }
  0xc3   :  { %v281_v18 = vadd.f32 1.0, %v302_v15 }
  0xc4   :  { %303 = vtanh.f32 %v278_v16 }
  0xc5   :  { %v283_v19 = vmul.f32 %v281_v18, %v267_v17 }
  0xc7   :  { %285 = vst.msk [vmem:[%s391_s3] sm:$0xff] %vm18_vm0, %v283_v19 }
  0xca   :  { %v304_v20 = vpop.eup %303 }
  0xcb   :  { %v282_v22 = vadd.f32 1.0, %v304_v20 }
  0xcd   :  { %v284_v23 = vmul.f32 %v282_v22, %v268_v21 }
  0xcf   :  { %286 = vst.msk [vmem:[%s391_s3 + $0x8] sm:$0xff] %vm18_vm0, %v284_v23 }

// kernel: transformer_layer.17
= control target key start
LH: loop header
LB: loop body
LE: loop exit
PB: predicated region body
PF: predicated region fallthrough
CT: control target
= control target key end

     0   :  { %vm24_vm0 = vcmask 261120   ;;  %s202_s0 = inlined_call_operand.vmem [shape: f32[16,32], index: 0, kind: input, shape index: {}]   ;;  %s203_s1 = inlined_call_operand.vmem [shape: f32[16,32], index: 1, kind: input, shape index: {}]   ;;  %s204_s2 = inlined_call_operand.vmem [shape: f32[1,32], index: 2, kind: input, shape index: {}]   ;;  %s205_s3 = inlined_call_operand.vmem [shape: f32[1,32], index: 3, kind: input, shape index: {}]   ;;  %s206_s4 = inlined_call_operand.hbm [shape: f32[16,32], index: 4, kind: output, shape index: {}]  }
   0x1   :  { %v18_v0 = vld [vmem:[%s202_s0] sm:$0xff] }
   0x2   :  { %v20_v1 = vld [vmem:[%s203_s1] sm:$0xff] }
   0x3   :  { %v22_v2 = vadd.f32 %v20_v1, %v18_v0 }
   0x4   :  { %9 = vsyncpa [#allocation3], 0  ;;  %v19_v3 = vld [vmem:[%s202_s0 + $0x8] sm:$0xff]  ;;  %v146_v8 = vmov 32.0   ;;  %v112_v37 = vld [vmem:[%s204_s2] ss:$0 sm:$0xff] }
   0x5   :  { %v21_v4 = vld [vmem:[%s203_s1 + $0x8] sm:$0xff]  ;;  %v25_v5 = vsel %vm24_vm0, %v22_v2, 0.0  ;;  %114 = vrcp.f32 %v146_v8  ;;  %v113_v43 = vld [vmem:[%s205_s3] ss:$0 sm:$0xff]  ;;  %s147_s2 = smov [#allocation2]   ;;  %s96_s28 = sshll.u32 %s206_s4, 4  ;;  %s97_s28 = int_to_ptr.hbm [resolvable:$true] %s96_s28 }
   0x6   :  { %26 = vadd.xlane.f32.xlu0 %v25_v5  ;;  %v23_v6 = vadd.f32 %v21_v4, %v19_v3  ;;  %s94_s25 = sshll.u32 %s147_s2, 4  ;;  %s148_s3 = smov 128   ;;  %s95_s25 = int_to_ptr.vmem [resolvable:$true] %s94_s25 }
   0x7   :  { %s149_s29 = smov 8  }
   0x8   :  { %v28_v7 = vsel %vm24_vm0, %v23_v6, 0.0 }
   0xb   :  { %v115_v9 = vpop.eup %114 }
   0xc   :  { %v32_v10 = vmul.f32 32.0, %v115_v9  ;;  %vm36_vm1 = vweird.f32 %v115_v9 }
   0xe   :  { %29 = vadd.xlane.f32.xlu0 %v28_v7  ;;  %v33_v11 = vsub.f32 1.0, %v32_v10 }
  0x10   :  { %v34_v12 = vmul.f32 %v115_v9, %v33_v11 }
  0x12   :  { %v35_v13 = vadd.f32 %v115_v9, %v34_v12 }
  0x14   :  { %v37_v14 = vsel %vm36_vm1, %v115_v9, %v35_v13 }
  0x79   :  { %v27_v15 = vpop.xlane.xlu0 %26 }
  0x7a   :  { %v38_v16 = vmul.f32 %v37_v14, %v27_v15 }
  0x7c   :  { %v40_v17 = vsub.f32 %v22_v2, %v38_v16 }
  0x7e   :  { %v42_v18 = vmul.f32 %v40_v17, %v40_v17 }
  0x80   :  { %v44_v19 = vsel %vm24_vm0, %v42_v18, 0.0 }
  0x81   :  { %45 = vadd.xlane.f32.xlu1 %v44_v19  ;;  %v30_v20 = vpop.xlane.xlu0 %29 }
  0x82   :  { %v39_v21 = vmul.f32 %v37_v14, %v30_v20 }
  0x84   :  { %v41_v22 = vsub.f32 %v23_v6, %v39_v21 }
  0x86   :  { %v43_v23 = vmul.f32 %v41_v22, %v41_v22 }
  0x88   :  { %v47_v24 = vsel %vm24_vm0, %v43_v23, 0.0 }
  0x89   :  { %48 = vadd.xlane.f32.xlu1 %v47_v24 }
  0xf4   :  { %v46_v25 = vpop.xlane.xlu1 %45 }
  0xf5   :  { %v50_v26 = vmul.f32 %v46_v25, %v37_v14 }
  0xf7   :  { %v52_v27 = vadd.f32 1e-05, %v50_v26 }
  0xf9   :  { %116 = vrsqrt.f32 %v52_v27  ;;  %vm60_vm3 = vweird.f32 %v52_v27 }
  0xfc   :  { %v49_v28 = vpop.xlane.xlu1 %48 }
  0xfd   :  { %v51_v29 = vmul.f32 %v49_v28, %v37_v14 }
  0xff   :  { %v117_v30 = vpop.eup %116  ;;  %v53_v31 = vadd.f32 1e-05, %v51_v29 }
 0x100   :  { %v55_v32 = vmul.f32 %v117_v30, %v52_v27  ;;  %vm61_vm2 = vweird.f32 %v117_v30 }
 0x101   :  { %118 = vrsqrt.f32 %v53_v31  ;;  %vm62_vm4 = vmor %vm60_vm3, %vm61_vm2  ;;  %vm70_vm6 = vweird.f32 %v53_v31 }
 0x102   :  { %v56_v33 = vmul.f32 %v117_v30, %v55_v32 }
 0x104   :  { %v57_v34 = vmul.f32 0.5, %v56_v33 }
 0x106   :  { %v58_v35 = vsub.f32 1.5, %v57_v34 }
 0x107   :  { %v119_v36 = vpop.eup %118 }
 0x108   :  { %v59_v38 = vmul.f32 %v117_v30, %v58_v35  ;;  %v65_v39 = vmul.f32 %v119_v36, %v53_v31  ;;  %vm71_vm5 = vweird.f32 %v119_v36 }
 0x109   :  { %vm72_vm7 = vmor %vm70_vm6, %vm71_vm5 }
 0x10a   :  { %v63_v40 = vsel %vm62_vm4, %v117_v30, %v59_v38  ;;  %v66_v41 = vmul.f32 %v119_v36, %v65_v39 }
 0x10b   :  { %v78_v42 = vmul.f32 %v112_v37, %v63_v40 }
 0x10c   :  { %v67_v44 = vmul.f32 0.5, %v66_v41 }
 0x10d   :  { %v80_v45 = vmul.f32 %v78_v42, %v40_v17 }
 0x10e   :  { %v68_v46 = vsub.f32 1.5, %v67_v44 }
 0x10f   :  { %v86_v47 = vadd.f32 %v113_v43, %v80_v45 }
 0x110   :  { %v69_v48 = vmul.f32 %v119_v36, %v68_v46 }
 0x111   :  { %88 = vst.msk [vmem:[#allocation2] sm:$0xff] %vm24_vm0, %v86_v47 }
 0x112   :  { %v73_v49 = vsel %vm72_vm7, %v119_v36, %v69_v48 }
 0x113   :  { %v79_v50 = vmul.f32 %v112_v37, %v73_v49 }
 0x115   :  { %v81_v51 = vmul.f32 %v79_v50, %v41_v22 }
 0x117   :  { %v87_v52 = vadd.f32 %v113_v43, %v81_v51 }
 0x119   :  { %89 = vst.msk [vmem:[#allocation2 + $0x8] sm:$0xff] %vm24_vm0, %v87_v52 }
 0x11a   :  { %102 = dma.vmem_to_hbm [thread:$0]  %s95_s25, 256, %s97_s28, [#allocation3], %s148_s3, %s148_s3, %s149_s29  }
 0x11b   :  { %144 = dma.done.wait [#allocation3], 256  }
 0x11c   :  { %145 = vsyncadd [#allocation3], 4294967040 }
 0x11d   :  { %107 = vsyncpa [#allocation3], 1 }

</bundles_post_ra>
